<compile_context>
chip_gen: v5e
topology: v5e:2x2
jax: 0.10.0
libtpu: 0.0.40
codegen_flags: <defaults>
</compile_context>

<pallas_src>
import functools

import jax
import jax.numpy as jnp
from jax.experimental import pallas as pl
from jax.experimental.pallas import tpu as pltpu

DROPOUT_P = 0.2


def _round_up(a: int, b: int) -> int:
    return ((a + b - 1) // b) * b


def _ffn_kernel(x_ref, w1_ref, b1_ref, w2_ref, b2_ref, o_ref, acc_ref, *,
                train: bool, drop_p: float, seed_mix: int, tm: int):
    # Grid: (row tiles of M, chunks of H).  x/out tiles stay resident across k.
    k = pl.program_id(1)
    last_k = pl.num_programs(1) - 1

    # Hoisted OUT of the pl.when body: program_id inside a cond branch does not
    # lower on the interpret fallback path (and it is free here anyway).
    if train and drop_p > 0.0:
        row_base = pl.program_id(0) * tm

    @pl.when(k == 0)
    def _():
        acc_ref[...] = jnp.zeros_like(acc_ref)

    # ---- Linear 1 (one H-chunk) + ReLU : bf16 MXU matmul, f32 accumulation ----
    h = jnp.dot(x_ref[...], w1_ref[...], preferred_element_type=jnp.float32)
    h = jnp.maximum(h + b1_ref[...], 0.0)

    # ---- Linear 2 (same H-chunk), accumulate into f32 VMEM scratch ----
    # NOTE: activations are down-cast to the weight dtype (bf16 by default) for
    # the second matmul; this is the documented precision/speed trade-off.
    acc_ref[...] += jnp.dot(h.astype(w2_ref.dtype), w2_ref[...],
                            preferred_element_type=jnp.float32)

    # ---- Finalize on the last H-chunk: bias-2, dropout, store ----
    @pl.when(k == last_k)
    def _():
        y = acc_ref[...] + b2_ref[...]
        if train and drop_p > 0.0:
            keep_prob = 1.0 - drop_p
            inv_keep = 1.0 / keep_prob
            ncols = y.shape[1]

            def _lsr(v, n):          # logical right shift on int32
                return (v >> n) & ((1 << (32 - n)) - 1)

            # Counter-based hash (lowbias32) of the global element index.
            # TODO(synk): torch's dropout RNG stream cannot be reproduced
            # bit-exactly; semantics (inverted dropout, P(keep)=0.8) match.
            rows = jax.lax.broadcasted_iota(jnp.int32, y.shape, 0) + row_base
            cols = jax.lax.broadcasted_iota(jnp.int32, y.shape, 1)
            z = rows * ncols + cols
            z = z ^ seed_mix
            z = (z ^ _lsr(z, 16)) * 0x7FEB352D
            z = (z ^ _lsr(z, 15)) * (-2073254261)      # 0x846CA68B as int32
            z = z ^ _lsr(z, 16)
            u = _lsr(z, 8).astype(jnp.float32) * (1.0 / (1 << 24))  # [0, 1)
            y = jnp.where(u < keep_prob, y * inv_keep, 0.0)
        o_ref[...] = y.astype(o_ref.dtype)


def _pick_th(H: int, th_req: int) -> int:
    """Largest divisor of H <= th_req that is a multiple of 256 (else 128)."""
    limit = max(128, min(th_req, H))
    for mult in (256, 128):
        cands = [d for d in range(mult, limit + 1, mult) if H % d == 0]
        if cands:
            return max(cands)
    # TODO(synk): pad H instead of making both weight matrices fully resident.
    return H


def _vmem_capacity_bytes() -> int:
    try:
        return int(pltpu.get_tpu_info().vmem_capacity_bytes)
    except Exception:
        return 64 * 1024 * 1024   # conservative (v7x per-TC size)


def feed_forward(x, w1, b1, w2, b2, *, train: bool = False, seed: int = 0,
                 tm: int | None = None, th: int = 512,
                 compute_dtype=jnp.bfloat16):
    """x: (B, T, C).  w1: (C, H), b1: (H,), w2: (H, C), b2: (C,) -> (B, T, C)."""
    B, T, C = x.shape
    H = w1.shape[1]
    M = B * T
    out_dtype = x.dtype

    if compute_dtype is None:
        compute_dtype = x.dtype
    x2 = x.reshape(M, C).astype(compute_dtype)
    w1c = w1.astype(compute_dtype)
    w2c = w2.astype(compute_dtype)
    b1c = b1.reshape(1, H).astype(jnp.float32)
    b2c = b2.reshape(1, C).astype(jnp.float32)

    wb = jnp.dtype(compute_dtype).itemsize
    ob = jnp.dtype(out_dtype).itemsize

    # Hidden-dim tile for streaming W1/W2 (never fall back to th = H for big H).
    th = _pick_th(H, th)

    # Row tile: capacity-aware default, multiple of 8, >= 2 tiles when M allows.
    vmem_cap = _vmem_capacity_bytes()
    vmem_budget = int(0.75 * vmem_cap)   # ~96 MiB on v5e/v6e, ~48 MiB on v7x
    if tm is None:
        tm = 1024 if vmem_cap >= 100 * 1024 * 1024 else 512
    tm = _round_up(max(int(tm), 8), 8)
    tm = min(tm, _round_up(M, 8))
    if M >= 16 and _round_up(M, tm) // tm < 2:
        tm = _round_up((M + 1) // 2, 8)      # keep both v7x TensorCores busy

    def est(tm_, nbuf_w):
        return (nbuf_w * 2 * C * th * wb        # W1 + W2 chunks (multi-buffered)
                + 2 * tm_ * C * wb              # x row tile (double-buffered)
                + 2 * tm_ * C * ob              # out tile   (double-buffered)
                + tm_ * C * 4                   # f32 accumulator scratch
                + tm_ * th * 4 + tm_ * th * wb  # f32 `h` temp + bf16 cast copy
                + nbuf_w * (th + C) * 4)        # bias chunks

    while est(tm, 2) > vmem_budget and tm > 64:
        tm = max(64, _round_up(tm // 2, 8))

    M_pad = _round_up(M, tm)
    num_row_tiles = M_pad // tm

    # TODO(synk): avoid this padded HBM copy by masking the final row tile.
    if M_pad != M:
        x2 = jnp.pad(x2, ((0, M_pad - M), (0, 0)))

    # 3-deep weight pipelining for small-M / decode-like calls.
    deep = (num_row_tiles <= 2 and (H // th) >= 3
            and hasattr(pl, "Buffered") and jax.default_backend() == "tpu"
            and est(tm, 3) <= vmem_budget)
    nbuf_w = 3 if deep else 2

    def _wspec(shape, index_map):
        if deep:
            try:
                return pl.BlockSpec(shape, index_map, pipeline_mode=pl.Buffered(3))
            except Exception:
                pass
        return pl.BlockSpec(shape, index_map)

    seed_mix = (int(seed) * 0x9E3779B9) & 0xFFFFFFFF
    if seed_mix >= 1 << 31:
        seed_mix -= 1 << 32

    kernel = functools.partial(_ffn_kernel, train=train, drop_p=DROPOUT_P,
                               seed_mix=seed_mix, tm=tm)

    vmem_limit = int(min(max(int(1.25 * est(tm, nbuf_w)), 16 * 1024 * 1024),
                         vmem_budget))

    cost = pl.CostEstimate(
        flops=4 * M_pad * C * H,
        transcendentals=0,
        bytes_accessed=(wb * M_pad * C + ob * M_pad * C
                        + num_row_tiles * wb * 2 * C * H     # weights re-streamed
                        + 4 * (H + C)),
    )

    grid = (num_row_tiles, H // th)
    out = pl.pallas_call(
        kernel,
        out_shape=jax.ShapeDtypeStruct((M_pad, C), out_dtype),
        grid_spec=pltpu.PrefetchScalarGridSpec(
            num_scalar_prefetch=0,
            grid=grid,
            in_specs=[
                pl.BlockSpec((tm, C), lambda i, k: (i, 0)),   # x tile (resident over k)
                _wspec((C, th), lambda i, k: (0, k)),         # W1 column chunk (streamed)
                pl.BlockSpec((1, th), lambda i, k: (0, k)),   # b1 chunk
                _wspec((th, C), lambda i, k: (k, 0)),         # W2 row chunk (streamed)
                pl.BlockSpec((1, C), lambda i, k: (0, 0)),    # b2
            ],
            out_specs=pl.BlockSpec((tm, C), lambda i, k: (i, 0)),
            scratch_shapes=[pltpu.VMEM((tm, C), jnp.float32)],
        ),
        compiler_params=pltpu.CompilerParams(
            dimension_semantics=("parallel", "arbitrary"),
            vmem_limit_bytes=vmem_limit,
        ),
        cost_estimate=cost,
    )(x2, w1c, b1c, w2c, b2c)

    if M_pad != M:
        out = out[:M]
    return out.reshape(B, T, C)


def init_params(key, n_embd):
    """Matches torch.nn.Linear default init (uniform +/- 1/sqrt(fan_in))."""
    hidden = 4 * n_embd
    k1, k2, k3, k4 = jax.random.split(key, 4)
    bound1 = 1.0 / float(n_embd) ** 0.5
    bound2 = 1.0 / float(hidden) ** 0.5
    w1 = jax.random.uniform(k1, (n_embd, hidden), jnp.float32, -bound1, bound1)
    b1 = jax.random.uniform(k2, (hidden,), jnp.float32, -bound1, bound1)
    w2 = jax.random.uniform(k3, (hidden, n_embd), jnp.float32, -bound2, bound2)
    b2 = jax.random.uniform(k4, (n_embd,), jnp.float32, -bound2, bound2)
    return w1, b1, w2, b2


if __name__ == "__main__":
    # Small shapes consistent with the module: n_embd = 384 => hidden = 1536.
    B, T, n_embd = 2, 8, 384
    key = jax.random.PRNGKey(0)
    kx, kp = jax.random.split(key)

    x = jax.random.normal(kx, (B, T, n_embd), dtype=jnp.float32)
    w1, b1, w2, b2 = init_params(kp, n_embd)

    # Reference mirrors the kernel's bf16-operand / f32-accumulation path.
    def reference(x, w1, b1, w2, b2):
        xm = x.reshape(-1, n_embd)
        h = jnp.dot(xm.astype(jnp.bfloat16), w1.astype(jnp.bfloat16),
                    preferred_element_type=jnp.float32) + b1[None, :]
        h = jnp.maximum(h, 0.0)
        y = jnp.dot(h.astype(jnp.bfloat16), w2.astype(jnp.bfloat16),
                    preferred_element_type=jnp.float32) + b2[None, :]
        return y.reshape(x.shape)

    ref = reference(x, w1, b1, w2, b2)

    # Eval mode (dropout = identity).
    y = jax.block_until_ready(feed_forward(x, w1, b1, w2, b2, train=False))
    assert y.shape == (B, T, n_embd)
    assert jnp.allclose(y, ref, atol=2e-2, rtol=2e-2), "eval mismatch vs reference"

    # Train mode: inverted dropout with keep prob 0.8.
    y_train = jax.block_until_ready(
        feed_forward(x, w1, b1, w2, b2, train=True, seed=42))
    assert y_train.shape == (B, T, n_embd)
    dropped = float(jnp.mean((y_train == 0.0).astype(jnp.float32)))
    assert 0.1 < dropped < 0.3, f"unexpected drop rate {dropped}"
    kept = y_train != 0.0
    assert jnp.allclose(jnp.where(kept, y_train, 0.0),
                        jnp.where(kept, ref / 0.8, 0.0),
                        atol=2e-2, rtol=2e-2), "kept values not scaled by 1/0.8"

    print("KERNEL_OK")
</pallas_src>

<mosaic_0001>
module attributes {stable_mosaic.version = 11 : i64} {
  func.func @_ffn_kernel(%arg0: i32, %arg1: i32, %arg2: memref<8x384xbf16, #tpu.memory_space<vmem>>, %arg3: memref<384x512xbf16, #tpu.memory_space<vmem>>, %arg4: memref<1x512xf32, #tpu.memory_space<vmem>>, %arg5: memref<512x384xbf16, #tpu.memory_space<vmem>>, %arg6: memref<1x384xf32, #tpu.memory_space<vmem>>, %arg7: memref<8x384xf32, #tpu.memory_space<vmem>>, %arg8: memref<8x384xf32, #tpu.memory_space<vmem>>) attributes {dimension_semantics = [#tpu.dimension_semantics<parallel>, #tpu.dimension_semantics<arbitrary>], iteration_bounds = array<i64: 2, 3>, scalar_prefetch = 0 : i64, scratch_operands = 1 : i64, tpu.core_type = #tpu.core_type<tc>, window_params = [{transform_indices = @transform_0, window_bounds = array<i64: 8, 384>}, {transform_indices = @transform_1, window_bounds = array<i64: 384, 512>}, {transform_indices = @transform_2, window_bounds = array<i64: 1, 512>}, {transform_indices = @transform_3, window_bounds = array<i64: 512, 384>}, {pipeline_mode = #tpu.pipeline_mode<synchronous>, transform_indices = @transform_4, window_bounds = array<i64: 1, 384>}, {transform_indices = @transform_5, window_bounds = array<i64: 8, 384>}]} {
    %c0_i32 = arith.constant 0 : i32
    %0 = arith.cmpi eq, %arg1, %c0_i32 : i32
    %1 = arith.extui %0 : i1 to i32
    %c0_i32_0 = arith.constant 0 : i32
    %2 = arith.cmpi ne, %1, %c0_i32_0 : i32
    scf.if %2 {
      %cst_15 = arith.constant 0.000000e+00 : f32
      %20 = vector.broadcast %cst_15 : f32 to vector<8x384xf32>
      %c0_16 = arith.constant 0 : index
      %c0_17 = arith.constant 0 : index
      %21 = vector.load %arg8[%c0_16, %c0_17] : memref<8x384xf32, #tpu.memory_space<vmem>>, vector<8x384xf32>
      tpu.vector_store %arg8[%c0_16, %c0_17], %20 {strides = array<i32>} : memref<8x384xf32, #tpu.memory_space<vmem>>, vector<8x384xf32>,
    } else {
    }
    %c0 = arith.constant 0 : index
    %c0_1 = arith.constant 0 : index
    %3 = vector.load %arg2[%c0, %c0_1] : memref<8x384xbf16, #tpu.memory_space<vmem>>, vector<8x384xbf16>
    %c0_2 = arith.constant 0 : index
    %c0_3 = arith.constant 0 : index
    %4 = vector.load %arg3[%c0_2, %c0_3] : memref<384x512xbf16, #tpu.memory_space<vmem>>, vector<384x512xbf16>
    %cst = arith.constant dense<0.000000e+00> : vector<8x512xf32>
    %5 = tpu.matmul %3, %4, %cst {dimension_numbers = #tpu.dot_dimension_numbers<[1], [0], [0], [1], [0, 0, 1, 1], [], []>} : vector<8x384xbf16>, vector<384x512xbf16>, vector<8x512xf32> -> vector<8x512xf32>
    %c0_4 = arith.constant 0 : index
    %c0_5 = arith.constant 0 : index
    %6 = vector.load %arg4[%c0_4, %c0_5] : memref<1x512xf32, #tpu.memory_space<vmem>>, vector<1x512xf32>
    %7 = vector.broadcast %6 : vector<1x512xf32> to vector<8x512xf32>
    %8 = arith.addf %5, %7 : vector<8x512xf32>
    %cst_6 = arith.constant 0.000000e+00 : f32
    %9 = vector.broadcast %cst_6 : f32 to vector<8x512xf32>
    %10 = arith.maximumf %8, %9 : vector<8x512xf32>
    %c0_7 = arith.constant 0 : index
    %c0_8 = arith.constant 0 : index
    %11 = vector.load %arg8[%c0_7, %c0_8] : memref<8x384xf32, #tpu.memory_space<vmem>>, vector<8x384xf32>
    %12 = arith.truncf %10 : vector<8x512xf32> to vector<8x512xbf16>
    %c0_9 = arith.constant 0 : index
    %c0_10 = arith.constant 0 : index
    %13 = vector.load %arg5[%c0_9, %c0_10] : memref<512x384xbf16, #tpu.memory_space<vmem>>, vector<512x384xbf16>
    %cst_11 = arith.constant dense<0.000000e+00> : vector<8x384xf32>
    %14 = tpu.matmul %12, %13, %cst_11 {dimension_numbers = #tpu.dot_dimension_numbers<[1], [0], [0], [1], [0, 0, 1, 1], [], []>} : vector<8x512xbf16>, vector<512x384xbf16>, vector<8x384xf32> -> vector<8x384xf32>
    %15 = arith.addf %11, %14 : vector<8x384xf32>
    %c0_12 = arith.constant 0 : index
    %c0_13 = arith.constant 0 : index
    %16 = vector.load %arg8[%c0_12, %c0_13] : memref<8x384xf32, #tpu.memory_space<vmem>>, vector<8x384xf32>
    tpu.vector_store %arg8[%c0_12, %c0_13], %15 {strides = array<i32>} : memref<8x384xf32, #tpu.memory_space<vmem>>, vector<8x384xf32>,
    %c2_i32 = arith.constant 2 : i32
    %17 = arith.cmpi eq, %arg1, %c2_i32 : i32
    %18 = arith.extui %17 : i1 to i32
    %c0_i32_14 = arith.constant 0 : i32
    %19 = arith.cmpi ne, %18, %c0_i32_14 : i32
    scf.if %19 {
      %c0_15 = arith.constant 0 : index
      %c0_16 = arith.constant 0 : index
      %20 = vector.load %arg8[%c0_15, %c0_16] : memref<8x384xf32, #tpu.memory_space<vmem>>, vector<8x384xf32>
      %c0_17 = arith.constant 0 : index
      %c0_18 = arith.constant 0 : index
      %21 = vector.load %arg6[%c0_17, %c0_18] : memref<1x384xf32, #tpu.memory_space<vmem>>, vector<1x384xf32>
      %22 = vector.broadcast %21 : vector<1x384xf32> to vector<8x384xf32>
      %23 = arith.addf %20, %22 : vector<8x384xf32>
      %c0_19 = arith.constant 0 : index
      %c0_20 = arith.constant 0 : index
      %24 = vector.load %arg7[%c0_19, %c0_20] : memref<8x384xf32, #tpu.memory_space<vmem>>, vector<8x384xf32>
      tpu.vector_store %arg7[%c0_19, %c0_20], %23 {strides = array<i32>} : memref<8x384xf32, #tpu.memory_space<vmem>>, vector<8x384xf32>,
    } else {
    }
    return
  }
  func.func @transform_0(%arg0: i32, %arg1: i32) -> (i32, i32) {
    %c0_i32 = arith.constant 0 : i32
    %c0_i32_0 = arith.constant 0 : i32
    return %arg0, %c0_i32 : i32, i32
  }
  func.func @transform_1(%arg0: i32, %arg1: i32) -> (i32, i32) {
    %c0_i32 = arith.constant 0 : i32
    %c0_i32_0 = arith.constant 0 : i32
    return %c0_i32, %arg1 : i32, i32
  }
  func.func @transform_2(%arg0: i32, %arg1: i32) -> (i32, i32) {
    %c0_i32 = arith.constant 0 : i32
    %c0_i32_0 = arith.constant 0 : i32
    return %c0_i32, %arg1 : i32, i32
  }
  func.func @transform_3(%arg0: i32, %arg1: i32) -> (i32, i32) {
    %c0_i32 = arith.constant 0 : i32
    %c0_i32_0 = arith.constant 0 : i32
    return %arg1, %c0_i32 : i32, i32
  }
  func.func @transform_4(%arg0: i32, %arg1: i32) -> (i32, i32) {
    %c0_i32 = arith.constant 0 : i32
    %c0_i32_0 = arith.constant 0 : i32
    %c0_i32_1 = arith.constant 0 : i32
    return %c0_i32, %c0_i32_0 : i32, i32
  }
  func.func @transform_5(%arg0: i32, %arg1: i32) -> (i32, i32) {
    %c0_i32 = arith.constant 0 : i32
    %c0_i32_0 = arith.constant 0 : i32
    return %arg0, %c0_i32 : i32, i32
  }
}

</mosaic_0001>

<bundles_post_ra>
// kernel: tpu_custom_call.1
= control target key start
LH: loop header
LB: loop body
LE: loop exit
PB: predicated region body
PF: predicated region fallthrough
CT: control target
= control target key end

     0   :  { %s4324_s0 = inlined_call_operand.hbm [shape: bf16[16,384], index: 0, kind: input, shape index: {}]   ;;  %s4325_s1 = inlined_call_operand.hbm [shape: bf16[384,1536], index: 1, kind: input, shape index: {}]   ;;  %s4326_s2 = inlined_call_operand.hbm [shape: f32[1,1536], index: 2, kind: input, shape index: {}]   ;;  %s4327_s3 = inlined_call_operand.hbm [shape: bf16[1536,384], index: 3, kind: input, shape index: {}]   ;;  %s4328_s4 = inlined_call_operand.hbm [shape: f32[1,384], index: 4, kind: input, shape index: {}]   ;;  %s4329_s5 = inlined_call_operand.hbm [shape: f32[16,384], index: 5, kind: output, shape index: {}]  }
   0x1   :  { %4343 = sst [smem:[#allocation29_spill]] %s4325_s1 }
   0x2   :  { %4344 = sst [smem:[#allocation30_spill]] %s4328_s4 }
   0x3   :  { %4345 = sst [smem:[#allocation31_spill]] %s4329_s5 }
   0x4   :  { %10 = vsyncpa [#allocation4], 0 }
   0x5   :  { %12 = vsyncpa [#allocation4 + $0x1], 0 }
   0x6   :  { %13 = vsyncpa [#allocation7], 0 }
   0x7   :  { %15 = vsyncpa [#allocation7 + $0x1], 0 }
   0x8   :  { %16 = vsyncpa [#allocation10], 0 }
   0x9   :  { %18 = vsyncpa [#allocation10 + $0x1], 0 }
   0xa   :  { %19 = vsyncpa [#allocation5], 0 }
   0xb   :  { %21 = vsyncpa [#allocation5 + $0x1], 0  ;;  %s3610_s18 = smov 0   ;;  %s3612_s19 = smov 0  }
   0xc   :  { %s3614_s20 = smov 0   ;;  %s3616_s21 = smov 0  }
   0xd   :  { %s3618_s22 = smov 0   ;;  %s3620_s23 = smov 0  }
   0xe   :  { %s3622_s24 = smov 0   ;;  %s3624_s25 = smov 0  }
   0xf   :  { %s3626_s26 = smov 0   ;;  %s3628_s27 = smov 0  }
  0x10   :  { %s3630_s28 = smov 0  }
  0x11 LB: > { %4346 = sst [smem:[#allocation18_spill]] %s3543_s21  ;;  %s3664_s29 = sadd.s32 4294967295, %s3571_s28   ;;  %s3571_s28 = sphi %s3630_s28, %s27_s28   ;;  %s3567_s27 = sphi %s3628_s27, %s4384_s27   ;;  %s3563_s26 = sphi %s3626_s26, %s4391_s26   ;;  %s3559_s25 = sphi %s3624_s25, %s4382_s25   ;;  %s3555_s24 = sphi %s3622_s24, %s4390_s24   ;;  %s3551_s23 = sphi %s3620_s23, %s4381_s23   ;;  %s3547_s22 = sphi %s3618_s22, %s4389_s22   ;;  %s3543_s21 = sphi %s3616_s21, %s4388_s21   ;;  %s3539_s20 = sphi %s3614_s20, %s4387_s20   ;;  %s3535_s19 = sphi %s3612_s19, %s4386_s19   ;;  %s3531_s18 = sphi %s3610_s18, %s4385_s18  }
  0x12   : > { %4347 = sst [smem:[#allocation19_spill]] %s3551_s23  ;;  %p54_p0 = scmp.eq.s32.totalorder %s3571_s28, 0 }
  0x13   : > { %4348 = sst [smem:[#allocation20_spill]] %s3555_s24  ;;  %p4332_p1 = scmp.eq.s32.totalorder %s3664_s29, 0 }
  0x14   : > { %4349 = sst [smem:[#allocation21_spill]] %s3559_s25  ;;  %p79_p2 = scmp.ne.s32.totalorder %s3539_s20, %s3535_s19 }
  0x15   : > { %4350 = sst [smem:[#allocation22_spill]] %s3567_s27  ;;  %p85_p3 = scmp.ne.s32.totalorder %s3535_s19, %s3531_s18 }
  0x16   : > { %p182_p4 = scmp.eq.s32.totalorder %s3664_s29, 5  ;;  %p2164_p5 = scmp.ge.s32.totalorder %s3571_s28, 1 }
  0x17   : > { %p81_p6 = por %p79_p2, %p54_p0  ;;  %p3678_p7 = por %p85_p3, %p4332_p1 }
  0x18   : > { %p195_p8 = scmp.lt.s32.totalorder %s3571_s28, 7  ;;  %s4352_s4 = sld [smem:[#allocation30_spill]] }
  0x19   : > { %s3573_s11 = smov [#allocation11]   ;;  %p4334_p11 = scmp.lt.s32.totalorder %s3571_s28, 6 }
  0x1a   : > { %p3686_p9 = pnand %p2164_p5, %p195_p8  ;;  %s209_s12 = sshll.u32 %s3573_s11, 4  ;;  %s210_s12 = int_to_ptr.vmem [resolvable:$true] %s209_s12 }
  0x1b   : > { %p3697_p13 = pnand %p4334_p11, %p81_p6  ;;  %s4331_s14 = sand.u32 1, %s3571_s28  }
  0x1c   : > { %p3167_p10 = pneg %p3686_p9  ;;  %s4330_s15 = sand.u32 1, %s3539_s20  }
  0x1d   : > { %s3705_s16 = smul.u32 768, %s4330_s15  ;;  %s2951_s17 = sshll.u32 %s3563_s26, 4 }
  0x1e   : > { %s207_s9 = sshll.u32 %s4352_s4, 4  ;;  %p3168_p12 = pnand %p3167_p10, %p4332_p1  ;;  %s208_s9 = int_to_ptr.hbm [resolvable:$true] %s207_s9 }
  0x1f   : > { %s4355_s1 = sld [smem:[#allocation29_spill]]  ;;  %s3714_s15 = scalar_lea.sflag [#allocation7], %s4331_s14 }
  0x20   : > { %3170 = dma.hbm_to_vmem [thread:$0]  (!%p3168_p12), %s208_s9, 48, %s210_s12, [#allocation10]  }
  0x21   : > { %s244_s9 = scalar_lea.vmem [#allocation6], %s3705_s16  ;;  %s3574_s18 = smov 768  }
  0x22   : > { %s252_s12 = sshll.u32 %s244_s9, 4  ;;  %s3576_s7 = smov 16   ;;  %s253_s12 = int_to_ptr.vmem [resolvable:$true] %s252_s12 }
  0x23   : > { %s36_s9 = sadd.s32 1, %s3563_s26  ;;  %s39_s30 = sadd.s32 1, %s3567_s27 }
  0x24   : > { %p37_p2 = scmp.ge.s32.totalorder %s36_s9, 3  ;;  %p53_p3 = scmp.ne.s32.totalorder %s3551_s23, %s3547_s22 }
  0x25   : > { %s249_s8 = scalar_lea.hbm %s4355_s1, %s2951_s17  ;;  %s3575_s17 = smov 256  }
  0x26   : > { %s250_s11 = sshll.u32 %s249_s8, 4  ;;  %s2163_s8 = sadd.s32 4294967294, %s3571_s28   ;;  %s251_s11 = int_to_ptr.hbm [resolvable:$true] %s250_s11 }
  0x27   : > { %3177 = dma.hbm_to_vmem [thread:$0]  (!%p3697_p13), %s251_s11, 12288, %s253_s12, %s3714_s15, %s3574_s18, %s3575_s17, %s3576_s7  }
  0x28   : > { %s46_s1 = sadd.s32 1, %s3551_s23  ;;  %p59_p5 = scmp.ne.s32.totalorder %s3547_s22, %s3543_s21 }
  0x29   : > { %s4393_s9 = smov (%p37_p2, %s36_s9), 0  ;;  %s4395_s30 = smov (!%p37_p2, %s39_s30), %s3567_s27 }
  0x2a   : > { %4356 = sst [smem:[#allocation23_spill]] %s4393_s9  ;;  %p3732_p6 = por %p54_p0, %p53_p3 }
  0x2b   : > { %p3741_p8 = por %p4332_p1, %p59_p5  ;;  %p41_p10 = scmp.ge.s32.totalorder %s4395_s30, 2 }
  0x2c   : > { %s69_s18 = ssub.s32 %s3563_s26, %s4393_s9  ;;  %p3749_p2 = por %p182_p4, %p53_p3 }
  0x2d   : > { %p70_p12 = scmp.eq.s32.totalorder %s69_s18, 0  ;;  %s4397_s30 = smov (%p41_p10, %s4395_s30), 0 }
  0x2e   : > { %s4359_s17 = scalar_select %p3749_p2, 1, 0 }
  0x2f   : > { %4361 = sst [smem:[#allocation25_spill]] %s4397_s30  ;;  %s4362_s7 = sadd.s32 1, %s3539_s20 }
  0x30   : > { %4360 = sst [smem:[#allocation24_spill]] %s4359_s17  ;;  %s43_s4 = ssub.s32 %s3567_s27, %s4397_s30 }
  0x31   : > { %s3758_s14 = scalar_select %p70_p12, %s3539_s20, %s4362_s7  }
  0x32   : > { %p188_p0 = scmp.eq.s32.totalorder %s2163_s8, 5  ;;  %p44_p1 = scmp.eq.s32.totalorder %s43_s4, 0 }
  0x33   : > { %4363 = sst [smem:[#allocation26_spill]] %s3758_s14  ;;  %s220_s5 = sand.u32 1, %s3551_s23  }
  0x34   : > { %p3766_p11 = por %p188_p0, %p59_p5  ;;  %s3144_s25 = smul.u32 12, %s220_s5 }
  0x35   : > { %s3771_s18 = scalar_select %p44_p1, %s3551_s23, %s46_s1  }
  0x36   : > { %s4364_s9 = scalar_select %p3766_p11, 1, 0 }
  0x37   : > { %4366 = sst [smem:[#allocation28_spill]] %s3771_s18  ;;  %p4367_p4 = scmp.lt.s32.totalorder %s3571_s28, 6 }
  0x38   : > { %4365 = sst [smem:[#allocation27_spill]] %s4364_s9  ;;  %s3145_s17 = smul.u32 12, %s3567_s27 }
  0x39   : > { %p3172_p3 = pnand %p4367_p4, %p3732_p6  ;;  %s4368_s24 = sand.u32 1, %s3539_s20  }
  0x3a   : > { %s2170_s7 = sshll.u32 %s4368_s24, 2  ;;  %s229_s4 = scalar_lea.hbm %s4324_s0, %s3145_s17 }
  0x3b   : > { %s224_s8 = scalar_lea.vmem [#allocation3], %s3144_s25  ;;  %s231_s9 = sshll.u32 %s229_s4, 4  ;;  %s232_s9 = int_to_ptr.hbm [resolvable:$true] %s231_s9 }
  0x3c   : > { %s233_s21 = sshll.u32 %s224_s8, 4  ;;  %s221_s1 = scalar_lea.sflag [#allocation4], %s220_s5  ;;  %s234_s21 = int_to_ptr.vmem [resolvable:$true] %s233_s21 }
  0x3d   : > { %3174 = dma.hbm_to_vmem [thread:$0]  (!%p3172_p3), %s232_s9, 192, %s234_s21, %s221_s1  }
  0x3e   : > { %s2171_s11 = sshll.u32 %s3563_s26, 2  ;;  %s266_s27 = scalar_lea.vmem [#allocation8], %s2170_s7 }
  0x3f   : > { %s274_s18 = sshll.u32 %s266_s27, 4  ;;  %s270_s30 = scalar_lea.hbm %s4326_s2, %s2171_s11  ;;  %s275_s18 = int_to_ptr.vmem [resolvable:$true] %s274_s18 }
  0x40   : > { %s272_s14 = sshll.u32 %s270_s30, 4  ;;  %s3148_s25 = smul.u32 768, %s3563_s26  ;;  %s273_s14 = int_to_ptr.hbm [resolvable:$true] %s272_s14 }
  0x41   : > { %3180 = dma.hbm_to_vmem [thread:$0]  (!%p3697_p13), %s273_s14, 64, %s275_s18, %s3714_s15  }
  0x42   : > { %s285_s17 = scalar_lea.vmem [#allocation9], %s3705_s16  ;;  %s291_s9 = scalar_lea.hbm %s4327_s3, %s3148_s25 }
  0x43   : > { %s294_s4 = sshll.u32 %s285_s17, 4  ;;  %s292_s7 = sshll.u32 %s291_s9, 4  ;;  %s295_s4 = int_to_ptr.vmem [resolvable:$true] %s294_s4  ;;  %s293_s7 = int_to_ptr.hbm [resolvable:$true] %s292_s7 }
  0x44   : > { %s4369_s27 = sand.u32 1, %s3571_s28   ;;  %s3577_s23 = smov 192  }
  0x45   : > { %s282_s8 = scalar_lea.sflag [#allocation10], %s4369_s27  ;;  %s3578_s1 = smov 12  }
  0x46   : > { %3183 = dma.hbm_to_vmem [thread:$0]  (!%p3697_p13), %s293_s7, 12288, %s295_s4, %s282_s8, %s3577_s23, %s3577_s23, %s3578_s1  }
  0x47   : > { %306 = sbr.rel (%p3686_p9) target bundleno = 547 (0x223), region = 40  ;;  %s3802_s15 = sand.u32 (!%p3686_p9), 1, %s3547_s22  }
  0x48   : > { %s3149_s16 = smul.u32 (!%p3686_p9), 12, %s3802_s15  ;;  %s309_s18 = scalar_lea.sflag (!%p3686_p9), [#allocation4], %s3802_s15 }
  0x4a   : > { %s3806_s11 = scalar_lea.vmem (!%p3686_p9), [#allocation3], %s3149_s16 }
  0x4c   : > { %3510 = dma.done.wait (%p3741_p8), %s309_s18, 192  }
  0x4d   : > { %3512 = vsyncadd (%p3741_p8), %s309_s18, 4294967104  ;;  %s318_s10 = sand.u32 1, %s3664_s29   ;;  %s320_s13 = sand.u32 1, %s3535_s19  }
  0x4e   : > { %s3150_s24 = smul.u32 768, %s320_s13  ;;  %s319_s30 = scalar_lea.sflag [#allocation7], %s318_s10 }
  0x50   : > { %s3814_s14 = scalar_lea.vmem [#allocation6], %s3150_s24 }
  0x51   : > { %3514 = dma.done.wait (%p3678_p7), %s319_s30, 12352  }
  0x52   : > { %3516 = vsyncadd (%p3678_p7), %s319_s30, 4294954944  ;;  %s3820_s25 = sshll.u32 %s320_s13, 2  ;;  %s339_s17 = scalar_lea.sflag [#allocation10], %s318_s10 }
  0x53   : > { %s332_s12 = scalar_lea.vmem [#allocation8], %s3820_s25  ;;  %s3823_s4 = scalar_lea.vmem [#allocation9], %s3150_s24 }
  0x54   : > { %3518 = dma.done.wait (%p3678_p7), %s339_s17, 12288  }
  0x55   : > { %3520 = vsyncadd (%p3678_p7), %s339_s17, 4294955008  ;;  %p4370_p1 = scmp.eq.s32.totalorder %s3664_s29, 0 }
  0x57   : > { %3522 = dma.done.wait (%p4370_p1), [#allocation10], 48   ;;  %p4371_p9 = pmov %p4370_p1 }
  0x58   : > { %s3151_s5 = smul.u32 24, %s3802_s15  ;;  %s4372_s9 = sld [smem:[#allocation20_spill]] }
  0x59   : > { %3524 = vsyncadd (%p4371_p9), [#allocation10], 4294967248 }
  0x5a   : > { %s3834_s21 = scalar_lea.vmem [#allocation12], %s3151_s5 }
  0x5e   : > { %p2178_p13 = scmp.ne.s32.totalorder %s4372_s9, 0 }
  0x60   : > { %396 = sbr.rel (%p2178_p13) target bundleno = 105 (0x69), region = 64 }
  0x65   : > { %v3579_v0 = vmov 0.0  }
  0x66   : > { %397 = vst [vmem:[#allocation2 + $0x10] sm:$0xff] %v3579_v0 }
  0x67   : > { %398 = vst [vmem:[#allocation2] sm:$0xff] %v3579_v0 }
  0x68   : > { %399 = vst [vmem:[#allocation2 + $0x8] sm:$0xff] %v3579_v0 }
  0x69 PF: > { %v2293_v1 = vld [vmem:[%s3814_s14 + $0xe0] sm:$0xf]  ;;  %v2982_v2 = vld [vmem:[%s3814_s14 + $0xec] sm:$0xf0]  ;;  %v2980_v10 = vld [vmem:[%s3814_s14 + $0xe4] sm:$0xf] }
  0x6a   : > { %v2421_v3 = vld [vmem:[%s3814_s14 + $0x1e0] sm:$0xf]  ;;  %v2294_v4 = vor.u32 %v2982_v2, %v2293_v1  ;;  %v3014_v5 = vld [vmem:[%s3814_s14 + $0x1ec] sm:$0xf0]  ;;  %v2295_v11 = vld [vmem:[%s3814_s14 + $0xf0] sm:$0xf0] }
  0x6b   : > { %v2549_v6 = vld [vmem:[%s3814_s14 + $0x2e0] sm:$0xf]  ;;  %v3046_v7 = vld [vmem:[%s3814_s14 + $0x2ec] sm:$0xf0]  ;;  %v2422_v8 = vor.u32 %v3014_v5, %v2421_v3  ;;  %v2298_v13 = vor.u32 %v2980_v10, %v2295_v11  ;;  %v2976_v21 = vld [vmem:[%s3814_s14 + $0xc4] sm:$0xf] }
  0x6c   : > { %v2550_v9 = vor.u32 %v3046_v7, %v2549_v6  ;;  %v2277_v12 = vld [vmem:[%s3814_s14 + $0xc0] sm:$0xf]  ;;  %999 = vmatpush.bf16.msra.mxu0 %v2294_v4  ;;  %v2978_v14 = vld [vmem:[%s3814_s14 + $0xcc] sm:$0xf0]  ;;  %v2279_v23 = vld [vmem:[%s3814_s14 + $0xd0] sm:$0xf0] }
  0x6d   : > { %v2405_v15 = vld [vmem:[%s3814_s14 + $0x1c0] sm:$0xf]  ;;  %v3010_v16 = vld [vmem:[%s3814_s14 + $0x1cc] sm:$0xf0]  ;;  %1012 = vmatpush.bf16.msra.mxu1 %v2422_v8  ;;  %v2278_v17 = vor.u32 %v2978_v14, %v2277_v12  ;;  %1038 = vmatpush.bf16.msra.mxu3 %v2298_v13  ;;  %v2282_v26 = vor.u32 %v2976_v21, %v2279_v23  ;;  %v2972_v32 = vld [vmem:[%s3814_s14 + $0xa4] sm:$0xf] }
  0x6e   : > { %1025 = vmatpush.bf16.msra.mxu2 %v2550_v9  ;;  %v2406_v18 = vor.u32 %v3010_v16, %v2405_v15  ;;  %v2533_v19 = vld [vmem:[%s3814_s14 + $0x2c0] sm:$0xf]  ;;  %v3042_v20 = vld [vmem:[%s3814_s14 + $0x2cc] sm:$0xf0]  ;;  %v2263_v33 = vld [vmem:[%s3814_s14 + $0xb0] sm:$0xf0] }
  0x6f   : > { %v2534_v22 = vor.u32 %v3042_v20, %v2533_v19  ;;  %v2261_v24 = vld [vmem:[%s3814_s14 + $0xa0] sm:$0xf]  ;;  %v2974_v25 = vld [vmem:[%s3814_s14 + $0xac] sm:$0xf0]  ;;  %v2266_v39 = vor.u32 %v2972_v32, %v2263_v33  ;;  %v2968_v43 = vld [vmem:[%s3814_s14 + $0x84] sm:$0xf] }
  0x70   : > { %v2389_v27 = vld [vmem:[%s3814_s14 + $0x1a0] sm:$0xf]  ;;  %v3006_v28 = vld [vmem:[%s3814_s14 + $0x1ac] sm:$0xf0]  ;;  %1000 = vmatpush.bf16.msra.mxu0 %v2278_v17  ;;  %v2262_v30 = vor.u32 %v2974_v25, %v2261_v24  ;;  %v2247_v44 = vld [vmem:[%s3814_s14 + $0x90] sm:$0xf0] }
  0x71   : > { %v2517_v29 = vld [vmem:[%s3814_s14 + $0x2a0] sm:$0xf]  ;;  %v3038_v31 = vld [vmem:[%s3814_s14 + $0x2ac] sm:$0xf0]  ;;  %1013 = vmatpush.bf16.msra.mxu1 %v2406_v18  ;;  %v2390_v34 = vor.u32 %v3006_v28, %v2389_v27  ;;  %1039 = vmatpush.bf16.msra.mxu3 %v2282_v26  ;;  %v2250_v51 = vor.u32 %v2968_v43, %v2247_v44  ;;  %v2964_v55 = vld [vmem:[%s3814_s14 + $0x64] sm:$0xf] }
  0x72   : > { %1026 = vmatpush.bf16.msra.mxu2 %v2534_v22  ;;  %v2518_v35 = vor.u32 %v3038_v31, %v2517_v29  ;;  %v2245_v36 = vld [vmem:[%s3814_s14 + $0x80] sm:$0xf]  ;;  %v2970_v37 = vld [vmem:[%s3814_s14 + $0x8c] sm:$0xf0]  ;;  %v2231_v56 = vld [vmem:[%s3814_s14 + $0x70] sm:$0xf0] }
  0x73   : > { %v2373_v38 = vld [vmem:[%s3814_s14 + $0x180] sm:$0xf]  ;;  %v3002_v40 = vld [vmem:[%s3814_s14 + $0x18c] sm:$0xf0]  ;;  %v2246_v45 = vor.u32 %v2970_v37, %v2245_v36  ;;  %v2234_v63 = vor.u32 %v2964_v55, %v2231_v56  ;;  %v2960_v3 = vld [vmem:[%s3814_s14 + $0x44] sm:$0xf] }
  0x74   : > { %v2501_v41 = vld [vmem:[%s3814_s14 + $0x280] sm:$0xf]  ;;  %v3034_v42 = vld [vmem:[%s3814_s14 + $0x28c] sm:$0xf0]  ;;  %1001 = vmatpush.bf16.msra.mxu0 %v2262_v30  ;;  %v2374_v46 = vor.u32 %v3002_v40, %v2373_v38  ;;  %v2215_v4 = vld [vmem:[%s3814_s14 + $0x50] sm:$0xf0] }
  0x75   : > { %1014 = vmatpush.bf16.msra.mxu1 %v2390_v34  ;;  %v2502_v47 = vor.u32 %v3034_v42, %v2501_v41  ;;  %v2229_v48 = vld [vmem:[%s3814_s14 + $0x60] sm:$0xf]  ;;  %v2966_v49 = vld [vmem:[%s3814_s14 + $0x6c] sm:$0xf0]  ;;  %1040 = vmatpush.bf16.msra.mxu3 %v2266_v39  ;;  %v2218_v11 = vor.u32 %v2960_v3, %v2215_v4  ;;  %v2956_v15 = vld [vmem:[%s3814_s14 + $0x24] sm:$0xf] }
  0x76   : > { %1027 = vmatpush.bf16.msra.mxu2 %v2518_v35  ;;  %v2357_v50 = vld [vmem:[%s3814_s14 + $0x160] sm:$0xf]  ;;  %v2998_v52 = vld [vmem:[%s3814_s14 + $0x16c] sm:$0xf0]  ;;  %v2230_v57 = vor.u32 %v2966_v49, %v2229_v48  ;;  %v2199_v16 = vld [vmem:[%s3814_s14 + $0x30] sm:$0xf0] }
  0x77   : > { %v2485_v53 = vld [vmem:[%s3814_s14 + $0x260] sm:$0xf]  ;;  %v3030_v54 = vld [vmem:[%s3814_s14 + $0x26c] sm:$0xf0]  ;;  %v2358_v58 = vor.u32 %v2998_v52, %v2357_v50  ;;  %v2202_v27 = vor.u32 %v2956_v15, %v2199_v16  ;;  %v2952_v28 = vld [vmem:[%s3814_s14 + $0x4] sm:$0xf] }
  0x78   : > { %1002 = vmatpush.bf16.msra.mxu0 %v2246_v45  ;;  %v2486_v59 = vor.u32 %v3030_v54, %v2485_v53  ;;  %v2213_v60 = vld [vmem:[%s3814_s14 + $0x40] sm:$0xf]  ;;  %v2962_v61 = vld [vmem:[%s3814_s14 + $0x4c] sm:$0xf0]  ;;  %v2183_v29 = vld [vmem:[%s3814_s14 + $0x10] sm:$0xf0] }
  0x79   : > { %1015 = vmatpush.bf16.msra.mxu1 %v2374_v46  ;;  %v2341_v62 = vld [vmem:[%s3814_s14 + $0x140] sm:$0xf]  ;;  %1041 = vmatpush.bf16.msra.mxu3 %v2250_v51  ;;  %v2994_v0 = vld [vmem:[%s3814_s14 + $0x14c] sm:$0xf0]  ;;  %v2214_v5 = vor.u32 %v2962_v61, %v2213_v60  ;;  %v400_v30 = vld [vmem:[%s3806_s11] sm:$0xff]  ;;  %v2186_v45 = vor.u32 %v2952_v28, %v2183_v29  ;;  %s4373_s29 = sld [smem:[#allocation20_spill]] }
  0x7a   : > { %1028 = vmatpush.bf16.msra.mxu2 %v2502_v47  ;;  %v2469_v1 = vld [vmem:[%s3814_s14 + $0x240] sm:$0xf]  ;;  %v3026_v2 = vld [vmem:[%s3814_s14 + $0x24c] sm:$0xf0]  ;;  %v2342_v6 = vor.u32 %v2994_v0, %v2341_v62  ;;  %v3012_v31 = vld [vmem:[%s3814_s14 + $0x1e4] sm:$0xf]  ;;  %v510_v43 = vunpack.c.l.b16 %v400_v30  ;;  %v511_v44 = vunpack.c.h.b16 %v400_v30 }
  0x7b   : > { %v2470_v7 = vor.u32 %v3026_v2, %v2469_v1  ;;  %v2197_v8 = vld [vmem:[%s3814_s14 + $0x20] sm:$0xf]  ;;  %v2958_v9 = vld [vmem:[%s3814_s14 + $0x2c] sm:$0xf0]  ;;  %v2423_v32 = vld [vmem:[%s3814_s14 + $0x1f0] sm:$0xf0] }
  0x7c   : > { %1003 = vmatpush.bf16.msra.mxu0 %v2230_v57  ;;  %v2325_v10 = vld [vmem:[%s3814_s14 + $0x120] sm:$0xf]  ;;  %v2990_v12 = vld [vmem:[%s3814_s14 + $0x12c] sm:$0xf0]  ;;  %v2198_v18 = vor.u32 %v2958_v9, %v2197_v8  ;;  %v3044_v33 = vld [vmem:[%s3814_s14 + $0x2e4] sm:$0xf]  ;;  %v2426_v46 = vor.u32 %v3012_v31, %v2423_v32  ;;  %v3919_v57 = vpack.c.b16 %v510_v43, %v510_v43  ;;  %v3923_v60 = vpack.c.b16 %v511_v44, %v511_v44 }
  0x7d   : > { %1016 = vmatpush.bf16.msra.mxu1 %v2358_v58  ;;  %1042 = vmatpush.bf16.msra.mxu3 %v2234_v63  ;;  %v2453_v13 = vld [vmem:[%s3814_s14 + $0x220] sm:$0xf]  ;;  %v3022_v14 = vld [vmem:[%s3814_s14 + $0x22c] sm:$0xf0]  ;;  %v2326_v22 = vor.u32 %v2990_v12, %v2325_v10  ;;  %v2551_v35 = vld [vmem:[%s3814_s14 + $0x2f0] sm:$0xf0] }
  0x7e   : > { %1029 = vmatpush.bf16.msra.mxu2 %v2486_v59  ;;  %v2181_v17 = vld [vmem:[%s3814_s14] sm:$0xf]  ;;  %v2954_v19 = vld [vmem:[%s3814_s14 + $0xc] sm:$0xf0]  ;;  %v2454_v23 = vor.u32 %v3022_v14, %v2453_v13  ;;  %v2301_v36 = vld [vmem:[%s3814_s14 + $0xe8] sm:$0xf]  ;;  %v2554_v47 = vor.u32 %v3044_v33, %v2551_v35 }
  0x7f   : > { %v2309_v20 = vld [vmem:[%s3814_s14 + $0x100] sm:$0xf]  ;;  %v2986_v21 = vld [vmem:[%s3814_s14 + $0x10c] sm:$0xf0]  ;;  %v2182_v34 = vor.u32 %v2954_v19, %v2181_v17  ;;  %v2983_v37 = vld [vmem:[%s3814_s14 + $0xf4] sm:$0xf0] }
  0x80   : > { %1004 = vmatpush.bf16.msra.mxu0 %v2214_v5  ;;  %v2437_v24 = vld [vmem:[%s3814_s14 + $0x200] sm:$0xf]  ;;  %v3018_v25 = vld [vmem:[%s3814_s14 + $0x20c] sm:$0xf0]  ;;  %v2310_v39 = vor.u32 %v2986_v21, %v2309_v20  ;;  %v2429_v41 = vld [vmem:[%s3814_s14 + $0x1e8] sm:$0xf]  ;;  %v2302_v48 = vor.u32 %v2983_v37, %v2301_v36 }
  0x81   : > { %1017 = vmatpush.bf16.msra.mxu1 %v2342_v6  ;;  %v401_v26 = vld [vmem:[%s3806_s11 + $0x8] sm:$0xf]  ;;  %1043 = vmatpush.bf16.msra.mxu3 %v2218_v11  ;;  %v2438_v40 = vor.u32 %v3018_v25, %v2437_v24  ;;  %v3015_v42 = vld [vmem:[%s3814_s14 + $0x1f4] sm:$0xf0]  ;;  %v3008_v49 = vld [vmem:[%s3814_s14 + $0x1c4] sm:$0xf] }
  0x82   : > { %1030 = vmatpush.bf16.msra.mxu2 %v2470_v7  ;;  %v512_v38 = vunpack.c.l.b16 %v401_v26  ;;  %v2407_v50 = vld [vmem:[%s3814_s14 + $0x1d0] sm:$0xf0]  ;;  %v3040_v51 = vld [vmem:[%s3814_s14 + $0x2c4] sm:$0xf]  ;;  %v2430_v52 = vor.u32 %v3015_v42, %v2429_v41  ;;  %v2285_v55 = vld [vmem:[%s3814_s14 + $0xc8] sm:$0xf] }
  0x83   : > { %v2535_v54 = vld [vmem:[%s3814_s14 + $0x2d0] sm:$0xf0]  ;;  %v2979_v56 = vld [vmem:[%s3814_s14 + $0xd4] sm:$0xf0]  ;;  %v2413_v58 = vld [vmem:[%s3814_s14 + $0x1c8] sm:$0xf]  ;;  %v2410_v61 = vor.u32 %v3008_v49, %v2407_v50 }
  0x84   : > { %1005 = vmatpush.bf16.msra.mxu0 %v2198_v18  ;;  %v3914_v53 = vpack.c.b16 %v512_v38, %v512_v38  ;;  %v3011_v59 = vld [vmem:[%s3814_s14 + $0x1d4] sm:$0xf0]  ;;  %v2538_v62 = vor.u32 %v3040_v51, %v2535_v54  ;;  %v2286_v63 = vor.u32 %v2979_v56, %v2285_v55  ;;  %v3004_v0 = vld [vmem:[%s3814_s14 + $0x1a4] sm:$0xf]  ;;  %v2391_v1 = vld [vmem:[%s3814_s14 + $0x1b0] sm:$0xf0] }
  0x85   : > { %1018 = vmatpush.bf16.msra.mxu1 %v2326_v22  ;;  %1044 = vmatpush.bf16.msra.mxu3 %v2202_v27  ;;  %v3036_v2 = vld [vmem:[%s3814_s14 + $0x2a4] sm:$0xf]  ;;  %v2414_v3 = vor.u32 %v3011_v59, %v2413_v58  ;;  %v2519_v4 = vld [vmem:[%s3814_s14 + $0x2b0] sm:$0xf0]  ;;  %v2269_v5 = vld [vmem:[%s3814_s14 + $0xa8] sm:$0xf]  ;;  %v2394_v9 = vor.u32 %v3004_v0, %v2391_v1 }
  0x86   : > { %1031 = vmatpush.bf16.msra.mxu2 %v2454_v23  ;;  %v2975_v6 = vld [vmem:[%s3814_s14 + $0xb4] sm:$0xf0]  ;;  %v2397_v7 = vld [vmem:[%s3814_s14 + $0x1a8] sm:$0xf]  ;;  %v2522_v10 = vor.u32 %v3036_v2, %v2519_v4  ;;  %v3000_v12 = vld [vmem:[%s3814_s14 + $0x184] sm:$0xf] }
  0x87   : > { %v3007_v8 = vld [vmem:[%s3814_s14 + $0x1b4] sm:$0xf0]  ;;  %v2270_v11 = vor.u32 %v2975_v6, %v2269_v5  ;;  %v2375_v13 = vld [vmem:[%s3814_s14 + $0x190] sm:$0xf0]  ;;  %v3032_v14 = vld [vmem:[%s3814_s14 + $0x284] sm:$0xf] }
  0x88   : > { %1006 = vmatpush.bf16.msra.mxu0 %v2182_v34  ;;  %v2398_v15 = vor.u32 %v3007_v8, %v2397_v7  ;;  %v2503_v16 = vld [vmem:[%s3814_s14 + $0x290] sm:$0xf0]  ;;  %v2253_v17 = vld [vmem:[%s3814_s14 + $0x88] sm:$0xf]  ;;  %v2971_v18 = vld [vmem:[%s3814_s14 + $0x94] sm:$0xf0]  ;;  %v2378_v21 = vor.u32 %v3000_v12, %v2375_v13 }
  0x89   : > { %1019 = vmatpush.bf16.msra.mxu1 %v2310_v39  ;;  %1045 = vmatpush.bf16.msra.mxu3 %v2186_v45  ;;  %v2381_v19 = vld [vmem:[%s3814_s14 + $0x188] sm:$0xf]  ;;  %v3003_v20 = vld [vmem:[%s3814_s14 + $0x194] sm:$0xf0]  ;;  %v2506_v22 = vor.u32 %v3032_v14, %v2503_v16  ;;  %v2254_v23 = vor.u32 %v2971_v18, %v2253_v17  ;;  %v2996_v24 = vld [vmem:[%s3814_s14 + $0x164] sm:$0xf] }
  0x8a   : > { %1032 = vmatpush.bf16.msra.mxu2 %v2438_v40  ;;  %v2359_v25 = vld [vmem:[%s3814_s14 + $0x170] sm:$0xf0]  ;;  %v3028_v26 = vld [vmem:[%s3814_s14 + $0x264] sm:$0xf]  ;;  %v2382_v27 = vor.u32 %v3003_v20, %v2381_v19  ;;  %v2237_v29 = vld [vmem:[%s3814_s14 + $0x68] sm:$0xf] }
  0x8b   : > { %1007 = vmatmul.bf16.vlgmr.msra.gmra.mxu0 %v3919_v57  ;;  %v2487_v28 = vld [vmem:[%s3814_s14 + $0x270] sm:$0xf0]  ;;  %v2967_v30 = vld [vmem:[%s3814_s14 + $0x74] sm:$0xf0]  ;;  %v2365_v31 = vld [vmem:[%s3814_s14 + $0x168] sm:$0xf]  ;;  %v2362_v33 = vor.u32 %v2996_v24, %v2359_v25 }
  0x8c   : > { %1051 = vmatpush.bf16.msrb.mxu0 %v2426_v46  ;;  %1020 = vmatmul.bf16.vlgmr.msra.gmra.mxu1 %v3923_v60  ;;  %v2999_v32 = vld [vmem:[%s3814_s14 + $0x174] sm:$0xf0]  ;;  %v2490_v34 = vor.u32 %v3028_v26, %v2487_v28  ;;  %v2238_v35 = vor.u32 %v2967_v30, %v2237_v29  ;;  %v2992_v36 = vld [vmem:[%s3814_s14 + $0x144] sm:$0xf]  ;;  %v2343_v37 = vld [vmem:[%s3814_s14 + $0x150] sm:$0xf0] }
  0x8d   : > { %1064 = vmatpush.bf16.msrb.mxu1 %v2554_v47  ;;  %1090 = vmatpush.bf16.msrb.mxu3 %v2430_v52  ;;  %v3024_v38 = vld [vmem:[%s3814_s14 + $0x244] sm:$0xf]  ;;  %v2366_v39 = vor.u32 %v2999_v32, %v2365_v31  ;;  %v2471_v40 = vld [vmem:[%s3814_s14 + $0x250] sm:$0xf0]  ;;  %v2221_v41 = vld [vmem:[%s3814_s14 + $0x48] sm:$0xf]  ;;  %v2346_v45 = vor.u32 %v2992_v36, %v2343_v37 }
  0x8e   : > { %1077 = vmatpush.bf16.msrb.mxu2 %v2302_v48  ;;  %1046 = vmatmul.bf16.vlgmr.msra.gmra.mxu3 %v3919_v57  ;;  %v2963_v42 = vld [vmem:[%s3814_s14 + $0x54] sm:$0xf0]  ;;  %v2349_v43 = vld [vmem:[%s3814_s14 + $0x148] sm:$0xf]  ;;  %v2474_v46 = vor.u32 %v3024_v38, %v2471_v40  ;;  %v2988_v48 = vld [vmem:[%s3814_s14 + $0x124] sm:$0xf] }
  0x8f   : > { %1033 = vmatmul.bf16.vlgmr.msra.gmra.mxu2 %v3914_v53  ;;  %v2995_v44 = vld [vmem:[%s3814_s14 + $0x154] sm:$0xf0]  ;;  %v2222_v47 = vor.u32 %v2963_v42, %v2221_v41  ;;  %v2327_v49 = vld [vmem:[%s3814_s14 + $0x130] sm:$0xf0]  ;;  %v3020_v50 = vld [vmem:[%s3814_s14 + $0x224] sm:$0xf] }
  0x90   : > { %1052 = vmatpush.bf16.msrb.mxu0 %v2410_v61  ;;  %v2350_v51 = vor.u32 %v2995_v44, %v2349_v43  ;;  %v2455_v52 = vld [vmem:[%s3814_s14 + $0x230] sm:$0xf0]  ;;  %v2205_v54 = vld [vmem:[%s3814_s14 + $0x28] sm:$0xf]  ;;  %v2959_v55 = vld [vmem:[%s3814_s14 + $0x34] sm:$0xf0]  ;;  %v2330_v59 = vor.u32 %v2988_v48, %v2327_v49 }
  0x91   : > { %1065 = vmatpush.bf16.msrb.mxu1 %v2538_v62  ;;  %1091 = vmatpush.bf16.msrb.mxu3 %v2414_v3  ;;  %v2333_v56 = vld [vmem:[%s3814_s14 + $0x128] sm:$0xf]  ;;  %v2991_v58 = vld [vmem:[%s3814_s14 + $0x134] sm:$0xf0]  ;;  %v2984_v61 = vld [vmem:[%s3814_s14 + $0x104] sm:$0xf]  ;;  %v2206_v0 = vor.u32 %v2959_v55, %v2205_v54 }
  0x92   : > { %1078 = vmatpush.bf16.msrb.mxu2 %v2286_v63  ;;  %v2311_v62 = vld [vmem:[%s3814_s14 + $0x110] sm:$0xf0]  ;;  %v2458_v63 = vor.u32 %v3020_v50, %v2455_v52  ;;  %v3016_v1 = vld [vmem:[%s3814_s14 + $0x204] sm:$0xf]  ;;  %v2189_v3 = vld [vmem:[%s3814_s14 + $0x8] sm:$0xf]  ;;  %v2334_v4 = vor.u32 %v2991_v58, %v2333_v56 }
  0x93   : > { %v2439_v2 = vld [vmem:[%s3814_s14 + $0x210] sm:$0xf0]  ;;  %v2955_v5 = vld [vmem:[%s3814_s14 + $0x14] sm:$0xf0]  ;;  %v2317_v6 = vld [vmem:[%s3814_s14 + $0x108] sm:$0xf] }
  0x94   : > { %1053 = vmatpush.bf16.msrb.mxu0 %v2394_v9  ;;  %v2987_v7 = vld [vmem:[%s3814_s14 + $0x114] sm:$0xf0]  ;;  %v2557_v8 = vld [vmem:[%s3814_s14 + $0x2e8] sm:$0xf]  ;;  %v2303_v12 = vld [vmem:[%s3814_s14 + $0xf8] sm:$0xf0]  ;;  %v2190_v16 = vor.u32 %v2955_v5, %v2189_v3 }
  0x95   : > { %1066 = vmatpush.bf16.msrb.mxu1 %v2522_v10  ;;  %1092 = vmatpush.bf16.msrb.mxu3 %v2398_v15  ;;  %v3047_v9 = vld [vmem:[%s3814_s14 + $0x2f4] sm:$0xf0]  ;;  %v2981_v10 = vld [vmem:[%s3814_s14 + $0xec] sm:$0xf]  ;;  %v2431_v14 = vld [vmem:[%s3814_s14 + $0x1f8] sm:$0xf0]  ;;  %v2442_v15 = vor.u32 %v3016_v1, %v2439_v2  ;;  %v2318_v19 = vor.u32 %v2987_v7, %v2317_v6 }
  0x96   : > { %1079 = vmatpush.bf16.msrb.mxu2 %v2270_v11  ;;  %v2314_v11 = vor.u32 %v2984_v61, %v2311_v62  ;;  %v3013_v13 = vld [vmem:[%s3814_s14 + $0x1ec] sm:$0xf]  ;;  %v2559_v18 = vld [vmem:[%s3814_s14 + $0x2f8] sm:$0xf0]  ;;  %v2558_v20 = vor.u32 %v3047_v9, %v2557_v8  ;;  %v3043_v24 = vld [vmem:[%s3814_s14 + $0x2d4] sm:$0xf0] }
  0x97   : > { %v3045_v17 = vld [vmem:[%s3814_s14 + $0x2ec] sm:$0xf]  ;;  %v2415_v29 = vld [vmem:[%s3814_s14 + $0x1d8] sm:$0xf0]  ;;  %v3039_v36 = vld [vmem:[%s3814_s14 + $0x2b4] sm:$0xf0] }
  0x98   : > { %1054 = vmatpush.bf16.msrb.mxu0 %v2378_v21  ;;  %v2306_v21 = vor.u32 %v2981_v10, %v2303_v12  ;;  %v2977_v25 = vld [vmem:[%s3814_s14 + $0xcc] sm:$0xf]  ;;  %v2562_v26 = vor.u32 %v3045_v17, %v2559_v18  ;;  %v2543_v31 = vld [vmem:[%s3814_s14 + $0x2d8] sm:$0xf0]  ;;  %v3035_v48 = vld [vmem:[%s3814_s14 + $0x294] sm:$0xf0] }
  0x99   : > { %1067 = vmatpush.bf16.msrb.mxu1 %v2506_v22  ;;  %1093 = vmatpush.bf16.msrb.mxu3 %v2382_v27  ;;  %v2434_v22 = vor.u32 %v3013_v13, %v2431_v14  ;;  %v2287_v27 = vld [vmem:[%s3814_s14 + $0xd8] sm:$0xf0]  ;;  %v3009_v28 = vld [vmem:[%s3814_s14 + $0x1cc] sm:$0xf]  ;;  %v2493_v62 = vld [vmem:[%s3814_s14 + $0x268] sm:$0xf] }
  0x9a   : > { %1080 = vmatpush.bf16.msrb.mxu2 %v2254_v23  ;;  %v2541_v23 = vld [vmem:[%s3814_s14 + $0x2c8] sm:$0xf]  ;;  %v3041_v30 = vld [vmem:[%s3814_s14 + $0x2cc] sm:$0xf]  ;;  %v2399_v41 = vld [vmem:[%s3814_s14 + $0x1b8] sm:$0xf0] }
  0x9b   : > { %v2542_v32 = vor.u32 %v3043_v24, %v2541_v23  ;;  %v2973_v37 = vld [vmem:[%s3814_s14 + $0xac] sm:$0xf]  ;;  %v2546_v38 = vor.u32 %v3041_v30, %v2543_v31  ;;  %v2527_v43 = vld [vmem:[%s3814_s14 + $0x2b8] sm:$0xf0]  ;;  %v2477_v10 = vld [vmem:[%s3814_s14 + $0x248] sm:$0xf] }
  0x9c   : > { %1055 = vmatpush.bf16.msrb.mxu0 %v2362_v33  ;;  %v2290_v33 = vor.u32 %v2977_v25, %v2287_v27  ;;  %v3005_v40 = vld [vmem:[%s3814_s14 + $0x1ac] sm:$0xf]  ;;  %v2383_v54 = vld [vmem:[%s3814_s14 + $0x198] sm:$0xf0]  ;;  %v3023_v23 = vld [vmem:[%s3814_s14 + $0x234] sm:$0xf0] }
  0x9d   : > { %1068 = vmatpush.bf16.msrb.mxu1 %v2490_v34  ;;  %1094 = vmatpush.bf16.msrb.mxu3 %v2366_v39  ;;  %v2418_v34 = vor.u32 %v3009_v28, %v2415_v29  ;;  %v2271_v39 = vld [vmem:[%s3814_s14 + $0xb8] sm:$0xf0]  ;;  %v3037_v42 = vld [vmem:[%s3814_s14 + $0x2ac] sm:$0xf]  ;;  %p2947_p7 = scmp.ne.s32.totalorder %s4373_s29, 2 }
  0x9e   : > { %1081 = vmatpush.bf16.msrb.mxu2 %v2238_v35  ;;  %v2525_v35 = vld [vmem:[%s3814_s14 + $0x2a8] sm:$0xf]  ;;  %v2969_v49 = vld [vmem:[%s3814_s14 + $0x8c] sm:$0xf]  ;;  %v2530_v50 = vor.u32 %v3037_v42, %v2527_v43  ;;  %v2511_v56 = vld [vmem:[%s3814_s14 + $0x298] sm:$0xf0] }
  0x9f   : > { %v2526_v44 = vor.u32 %v3039_v36, %v2525_v35  ;;  %v3001_v52 = vld [vmem:[%s3814_s14 + $0x18c] sm:$0xf]  ;;  %v2239_v2 = vld [vmem:[%s3814_s14 + $0x78] sm:$0xf0]  ;;  %v3019_v35 = vld [vmem:[%s3814_s14 + $0x214] sm:$0xf0] }
  0xa0   : > { %1056 = vmatpush.bf16.msrb.mxu0 %v2346_v45  ;;  %v2274_v45 = vor.u32 %v2973_v37, %v2271_v39  ;;  %v3033_v55 = vld [vmem:[%s3814_s14 + $0x28c] sm:$0xf]  ;;  %v2386_v61 = vor.u32 %v3001_v52, %v2383_v54  ;;  %v2495_v6 = vld [vmem:[%s3814_s14 + $0x278] sm:$0xf0]  ;;  %v2649_v43 = vld [vmem:[%s3823_s4 + $0xa8] sm:$0xf] }
  0xa1   : > { %1069 = vmatpush.bf16.msrb.mxu1 %v2474_v46  ;;  %1095 = vmatpush.bf16.msrb.mxu3 %v2350_v51  ;;  %v2402_v46 = vor.u32 %v3005_v40, %v2399_v41  ;;  %v2255_v51 = vld [vmem:[%s3814_s14 + $0x98] sm:$0xf0]  ;;  %v2514_v1 = vor.u32 %v3033_v55, %v2511_v56  ;;  %v2997_v3 = vld [vmem:[%s3814_s14 + $0x16c] sm:$0xf]  ;;  %v2637_v52 = vld [vmem:[%s3823_s4 + $0x90] sm:$0xf] }
  0xa2   : > { %1082 = vmatpush.bf16.msrb.mxu2 %v2222_v47  ;;  %v2509_v47 = vld [vmem:[%s3814_s14 + $0x288] sm:$0xf]  ;;  %v3029_v5 = vld [vmem:[%s3814_s14 + $0x26c] sm:$0xf]  ;;  %v2223_v14 = vld [vmem:[%s3814_s14 + $0x58] sm:$0xf0] }
  0xa3   : > { %v2510_v58 = vor.u32 %v3035_v48, %v2509_v47  ;;  %v2961_v12 = vld [vmem:[%s3814_s14 + $0x4c] sm:$0xf]  ;;  %v2498_v13 = vor.u32 %v3029_v5, %v2495_v6  ;;  %v2479_v18 = vld [vmem:[%s3814_s14 + $0x258] sm:$0xf0]  ;;  %v3067_v54 = vld [vmem:[%s3823_s4 + $0x98] sm:$0xf0] }
  0xa4   : > { %1057 = vmatpush.bf16.msrb.mxu0 %v2330_v59  ;;  %v2258_v59 = vor.u32 %v2969_v49, %v2255_v51  ;;  %v3025_v17 = vld [vmem:[%s3814_s14 + $0x24c] sm:$0xf]  ;;  %v2335_v28 = vld [vmem:[%s3814_s14 + $0x138] sm:$0xf0]  ;;  %v2733_v56 = vld [vmem:[%s3823_s4 + $0x150] sm:$0xf] }
  0xa5   : > { %1070 = vmatpush.bf16.msrb.mxu1 %v2458_v63  ;;  %1096 = vmatpush.bf16.msrb.mxu3 %v2334_v4  ;;  %v3031_v63 = vld [vmem:[%s3814_s14 + $0x274] sm:$0xf0]  ;;  %v2367_v4 = vld [vmem:[%s3814_s14 + $0x178] sm:$0xf0]  ;;  %v2957_v24 = vld [vmem:[%s3814_s14 + $0x2c] sm:$0xf]  ;;  %v2482_v25 = vor.u32 %v3025_v17, %v2479_v18 }
  0xa6   : > { %1083 = vmatpush.bf16.msrb.mxu2 %v2206_v0  ;;  %v2965_v0 = vld [vmem:[%s3814_s14 + $0x6c] sm:$0xf]  ;;  %v2494_v7 = vor.u32 %v3031_v63, %v2493_v62  ;;  %v2370_v9 = vor.u32 %v2997_v3, %v2367_v4  ;;  %v2463_v30 = vld [vmem:[%s3814_s14 + $0x238] sm:$0xf0]  ;;  %v2613_v3 = vld [vmem:[%s3823_s4 + $0x60] sm:$0xf] }
  0xa7   : > { %v2242_v8 = vor.u32 %v2965_v0, %v2239_v2  ;;  %v2989_v27 = vld [vmem:[%s3814_s14 + $0x12c] sm:$0xf]  ;;  %v2191_v37 = vld [vmem:[%s3814_s14 + $0x18] sm:$0xf0]  ;;  %v2721_v0 = vld [vmem:[%s3823_s4 + $0x138] sm:$0xf] }
  0xa8   : > { %1058 = vmatpush.bf16.msrb.mxu0 %v2314_v11  ;;  %v3027_v11 = vld [vmem:[%s3814_s14 + $0x254] sm:$0xf0]  ;;  %v3021_v29 = vld [vmem:[%s3814_s14 + $0x22c] sm:$0xf]  ;;  %v2319_v40 = vld [vmem:[%s3814_s14 + $0x118] sm:$0xf0] }
  0xa9   : > { %1071 = vmatpush.bf16.msrb.mxu1 %v2442_v15  ;;  %1097 = vmatpush.bf16.msrb.mxu3 %v2318_v19  ;;  %v2993_v15 = vld [vmem:[%s3814_s14 + $0x14c] sm:$0xf]  ;;  %v2478_v19 = vor.u32 %v3027_v11, %v2477_v10  ;;  %v2447_v42 = vld [vmem:[%s3814_s14 + $0x218] sm:$0xf0]  ;;  %v3061_v4 = vld [vmem:[%s3823_s4 + $0x68] sm:$0xf0] }
  0xaa   : > { %1084 = vmatpush.bf16.msrb.mxu2 %v2190_v16  ;;  %v2351_v16 = vld [vmem:[%s3814_s14 + $0x158] sm:$0xf0]  ;;  %v2953_v36 = vld [vmem:[%s3814_s14 + $0xc] sm:$0xf]  ;;  %v2709_v6 = vld [vmem:[%s3823_s4 + $0x120] sm:$0xf] }
  0xab   : > { %1059 = vmatmul.bf16.vlgmr.msrb.gmra.mxu0 %v3923_v60  ;;  %v2985_v39 = vld [vmem:[%s3814_s14 + $0x10c] sm:$0xf]  ;;  %v3094_v47 = vld [vmem:[%s3823_s4 + $0x170] sm:$0xf0]  ;;  %v2194_v48 = vor.u32 %v2953_v36, %v2191_v37  ;;  %v2577_v18 = vld [vmem:[%s3823_s4 + $0x18] sm:$0xf] }
  0xac   : > { %1103 = vmatpush.bf16.msra.mxu0 %v2558_v20  ;;  %1072 = vmatmul.bf16.vlgmr.msrb.gmra.mxu1 %v3914_v53  ;;  %v2226_v20 = vor.u32 %v2961_v12, %v2223_v14  ;;  %v3017_v41 = vld [vmem:[%s3814_s14 + $0x20c] sm:$0xf]  ;;  %v2322_v49 = vor.u32 %v2985_v39, %v2319_v40  ;;  %v3082_v10 = vld [vmem:[%s3823_s4 + $0x110] sm:$0xf0]  ;;  %v2589_v12 = vld [vmem:[%s3823_s4 + $0x30] sm:$0xf] }
  0xad   : > { %1116 = vmatpush.bf16.msra.mxu1 %v2306_v21  ;;  %1142 = vmatpush.bf16.msra.mxu3 %v2562_v26  ;;  %v2354_v21 = vor.u32 %v2993_v15, %v2351_v16  ;;  %v2207_v26 = vld [vmem:[%s3814_s14 + $0x38] sm:$0xf0]  ;;  %v3064_v62 = vld [vmem:[%s3823_s4 + $0x80] sm:$0xf0]  ;;  %v2685_v15 = vld [vmem:[%s3823_s4 + $0xf0] sm:$0xf] }
  0xae   : > { %1129 = vmatpush.bf16.msra.mxu2 %v2434_v22  ;;  %1098 = vmatmul.bf16.vlgmr.msrb.gmra.mxu3 %v3923_v60  ;;  %v2461_v22 = vld [vmem:[%s3814_s14 + $0x228] sm:$0xf]  ;;  %v3079_v16 = vld [vmem:[%s3823_s4 + $0xf8] sm:$0xf0]  ;;  %v3057_v37 = vld [vmem:[%s3823_s4 + $0x4c] sm:$0xf] }
  0xaf   : > { %1085 = vmatmul.bf16.vlgmr.msrb.gmra.mxu2 %v3919_v57  ;;  %v2462_v31 = vor.u32 %v3023_v23, %v2461_v22  ;;  %v2565_v22 = vld [vmem:[%s3823_s4] sm:$0xf]  ;;  %v3049_v23 = vld [vmem:[%s3823_s4 + $0x8] sm:$0xf0]  ;;  %v2673_v39 = vld [vmem:[%s3823_s4 + $0xd8] sm:$0xf] }
  0xb0   : > { %1104 = vmatpush.bf16.msra.mxu0 %v2542_v32  ;;  %v2445_v32 = vld [vmem:[%s3814_s14 + $0x208] sm:$0xf]  ;;  %v3076_v40 = vld [vmem:[%s3823_s4 + $0xe0] sm:$0xf0] }
  0xb1   : > { %1117 = vmatpush.bf16.msra.mxu1 %v2290_v33  ;;  %1143 = vmatpush.bf16.msra.mxu3 %v2546_v38  ;;  %v2210_v33 = vor.u32 %v2957_v24, %v2207_v26  ;;  %v2466_v38 = vor.u32 %v3021_v29, %v2463_v30  ;;  %v3069_v24 = vld [vmem:[%s3823_s4 + $0xac] sm:$0xf]  ;;  %v2566_v26 = vor.u32 %v3049_v23, %v2565_v22  ;;  %v2639_v29 = vld [vmem:[%s3823_s4 + $0x9c] sm:$0xf0]  ;;  %v3106_v22 = vld [vmem:[%s3823_s4 + $0x1d0] sm:$0xf0] }
  0xb2   : > { %1130 = vmatpush.bf16.msra.mxu2 %v2418_v34  ;;  %v2338_v34 = vor.u32 %v2989_v27, %v2335_v28  ;;  %v3066_v28 = vld [vmem:[%s3823_s4 + $0x94] sm:$0xf]  ;;  %v2913_v23 = vld [vmem:[%s3823_s4 + $0x2b8] sm:$0xf] }
  0xb3   : > { %v2642_v30 = vor.u32 %v3066_v28, %v2639_v29  ;;  %v2699_v28 = vld [vmem:[%s3823_s4 + $0x114] sm:$0xf0] }
  0xb4   : > { %1105 = vmatpush.bf16.msra.mxu0 %v2526_v44  ;;  %v3070_v44 = vld [vmem:[%s3823_s4 + $0xb0] sm:$0xf0] }
  0xb5   : > { %1118 = vmatpush.bf16.msra.mxu1 %v2274_v45  ;;  %1144 = vmatpush.bf16.msra.mxu3 %v2530_v50  ;;  %v2446_v45 = vor.u32 %v3019_v35, %v2445_v32  ;;  %v2450_v50 = vor.u32 %v3017_v41, %v2447_v42  ;;  %v2650_v51 = vor.u32 %v3070_v44, %v2649_v43  ;;  %v2627_v32 = vld [vmem:[%s3823_s4 + $0x84] sm:$0xf0]  ;;  %v2615_v35 = vld [vmem:[%s3823_s4 + $0x6c] sm:$0xf0]  ;;  %v3054_v43 = vld [vmem:[%s3823_s4 + $0x34] sm:$0xf] }
  0xb6   : > { %1131 = vmatpush.bf16.msra.mxu2 %v2402_v46  ;;  %v2745_v46 = vld [vmem:[%s3823_s4 + $0x168] sm:$0xf]  ;;  %v2674_v41 = vor.u32 %v3076_v40, %v2673_v39  ;;  %v2591_v44 = vld [vmem:[%s3823_s4 + $0x3c] sm:$0xf0] }
  0xb7   : > { %v2746_v55 = vor.u32 %v3094_v47, %v2745_v46  ;;  %v3118_v46 = vld [vmem:[%s3823_s4 + $0x230] sm:$0xf0]  ;;  %v2687_v39 = vld [vmem:[%s3823_s4 + $0xfc] sm:$0xf0] }
  0xb8   : > { %1106 = vmatpush.bf16.msra.mxu0 %v2510_v58  ;;  %v3091_v58 = vld [vmem:[%s3823_s4 + $0x158] sm:$0xf0] }
  0xb9   : > { %1119 = vmatpush.bf16.msra.mxu1 %v2258_v59  ;;  %1145 = vmatpush.bf16.msra.mxu3 %v2514_v1  ;;  %v2638_v59 = vor.u32 %v3067_v54, %v2637_v52  ;;  %v2734_v63 = vor.u32 %v3091_v58, %v2733_v56  ;;  %v3088_v1 = vld [vmem:[%s3823_s4 + $0x140] sm:$0xf0]  ;;  %v3051_v52 = vld [vmem:[%s3823_s4 + $0x1c] sm:$0xf]  ;;  %v3093_v54 = vld [vmem:[%s3823_s4 + $0x16c] sm:$0xf] }
  0xba   : > { %1132 = vmatpush.bf16.msra.mxu2 %v2386_v61  ;;  %v2625_v61 = vld [vmem:[%s3823_s4 + $0x78] sm:$0xf]  ;;  %v2722_v5 = vor.u32 %v3088_v1, %v2721_v0  ;;  %v2579_v56 = vld [vmem:[%s3823_s4 + $0x24] sm:$0xf0]  ;;  %v3048_v1 = vld [vmem:[%s3823_s4 + $0x4] sm:$0xf] }
  0xbb   : > { %v2626_v2 = vor.u32 %v3064_v62, %v2625_v61  ;;  %v3115_v61 = vld [vmem:[%s3823_s4 + $0x218] sm:$0xf0]  ;;  %v2582_v0 = vor.u32 %v3051_v52, %v2579_v56  ;;  %v3097_v56 = vld [vmem:[%s3823_s4 + $0x188] sm:$0xf0] }
  0xbc   : > { %1107 = vmatpush.bf16.msra.mxu0 %v2494_v7  ;;  %v2601_v7 = vld [vmem:[%s3823_s4 + $0x48] sm:$0xf] }
  0xbd   : > { %1120 = vmatpush.bf16.msra.mxu1 %v2242_v8  ;;  %1146 = vmatpush.bf16.msra.mxu3 %v2498_v13  ;;  %v3058_v8 = vld [vmem:[%s3823_s4 + $0x50] sm:$0xf0]  ;;  %v3055_v13 = vld [vmem:[%s3823_s4 + $0x38] sm:$0xf0] }
  0xbe   : > { %1133 = vmatpush.bf16.msra.mxu2 %v2370_v9  ;;  %v2697_v9 = vld [vmem:[%s3823_s4 + $0x108] sm:$0xf]  ;;  %v2602_v11 = vor.u32 %v3058_v8, %v2601_v7  ;;  %v2590_v17 = vor.u32 %v3055_v13, %v2589_v12  ;;  %v3142_v7 = vld [vmem:[%s3823_s4 + $0x2f0] sm:$0xf0]  ;;  %v3087_v8 = vld [vmem:[%s3823_s4 + $0x13c] sm:$0xf] }
  0xbf   : > { %v2698_v14 = vor.u32 %v3082_v10, %v2697_v9  ;;  %v2805_v12 = vld [vmem:[%s3823_s4 + $0x1e0] sm:$0xf]  ;;  %v3109_v13 = vld [vmem:[%s3823_s4 + $0x1e8] sm:$0xf0] }
  0xc0   : > { %1108 = vmatpush.bf16.msra.mxu0 %v2478_v19  ;;  %v3052_v19 = vld [vmem:[%s3823_s4 + $0x20] sm:$0xf0] }
  0xc1   : > { %1121 = vmatpush.bf16.msra.mxu1 %v2226_v20  ;;  %1147 = vmatpush.bf16.msra.mxu3 %v2482_v25  ;;  %v2686_v20 = vor.u32 %v3079_v16, %v2685_v15  ;;  %v2651_v25 = vld [vmem:[%s3823_s4 + $0xb4] sm:$0xf0]  ;;  %v2806_v15 = vor.u32 %v3109_v13, %v2805_v12  ;;  %v3139_v16 = vld [vmem:[%s3823_s4 + $0x2d8] sm:$0xf0]  ;;  %v3114_v13 = vld [vmem:[%s3823_s4 + $0x214] sm:$0xf] }
  0xc2   : > { %1134 = vmatpush.bf16.msra.mxu2 %v2354_v21  ;;  %v2578_v21 = vor.u32 %v3052_v19, %v2577_v18  ;;  %v2654_v27 = vor.u32 %v3069_v24, %v2651_v25  ;;  %v2711_v18 = vld [vmem:[%s3823_s4 + $0x12c] sm:$0xf0]  ;;  %v3136_v25 = vld [vmem:[%s3823_s4 + $0x2c0] sm:$0xf0] }
  0xc4   : > { %1109 = vmatpush.bf16.msra.mxu0 %v2462_v31  ;;  %v3063_v31 = vld [vmem:[%s3823_s4 + $0x7c] sm:$0xf] }
  0xc5   : > { %1122 = vmatpush.bf16.msra.mxu1 %v2210_v33  ;;  %1148 = vmatpush.bf16.msra.mxu3 %v2466_v38  ;;  %v2630_v33 = vor.u32 %v3063_v31, %v2627_v32  ;;  %v2603_v38 = vld [vmem:[%s3823_s4 + $0x54] sm:$0xf0]  ;;  %v3103_v31 = vld [vmem:[%s3823_s4 + $0x1b8] sm:$0xf0]  ;;  %v2901_v32 = vld [vmem:[%s3823_s4 + $0x2a0] sm:$0xf] }
  0xc6   : > { %1135 = vmatpush.bf16.msra.mxu2 %v2338_v34  ;;  %v3060_v34 = vld [vmem:[%s3823_s4 + $0x64] sm:$0xf]  ;;  %v2606_v42 = vor.u32 %v3057_v37, %v2603_v38  ;;  %v3078_v38 = vld [vmem:[%s3823_s4 + $0xf4] sm:$0xf] }
  0xc7   : > { %v2618_v36 = vor.u32 %v3060_v34, %v2615_v35  ;;  %v3133_v35 = vld [vmem:[%s3823_s4 + $0x2a8] sm:$0xf0]  ;;  %v2690_v40 = vor.u32 %v3078_v38, %v2687_v39  ;;  %v2927_v39 = vld [vmem:[%s3823_s4 + $0x2dc] sm:$0xf0] }
  0xc8   : > { %1110 = vmatpush.bf16.msra.mxu0 %v2446_v45  ;;  %v2841_v45 = vld [vmem:[%s3823_s4 + $0x228] sm:$0xf] }
  0xc9   : > { %1123 = vmatpush.bf16.msra.mxu1 %v2194_v48  ;;  %1149 = vmatpush.bf16.msra.mxu3 %v2450_v50  ;;  %v2842_v47 = vor.u32 %v3118_v46, %v2841_v45  ;;  %v2661_v48 = vld [vmem:[%s3823_s4 + $0xc0] sm:$0xf]  ;;  %v2594_v50 = vor.u32 %v3054_v43, %v2591_v44  ;;  %v2889_v43 = vld [vmem:[%s3823_s4 + $0x288] sm:$0xf] }
  0xca   : > { %1136 = vmatpush.bf16.msra.mxu2 %v2322_v49  ;;  %v3073_v49 = vld [vmem:[%s3823_s4 + $0xc8] sm:$0xf0] }
  0xcb   : > { %1111 = vmatmul.bf16.vlgmr.msra.gmra.mxu0 %v3914_v53 }
  0xcc   : > { %1806 = vmatpush.bf16.msrb.mxu0 %v2650_v51  ;;  %1124 = vmatmul.bf16.vlgmr.msra.gmra.mxu1 %v3919_v57  ;;  %v3085_v57 = vld [vmem:[%s3823_s4 + $0x128] sm:$0xf0]  ;;  %v2662_v51 = vor.u32 %v3073_v49, %v2661_v48 }
  0xcd   : > { %1819 = vmatpush.bf16.msrb.mxu1 %v2746_v55  ;;  %1137 = vmatmul.bf16.vlgmr.msra.gmra.mxu2 %v3923_v60  ;;  %v2614_v60 = vor.u32 %v3061_v4, %v2613_v3  ;;  %v2747_v55 = vld [vmem:[%s3823_s4 + $0x174] sm:$0xf0]  ;;  %v2735_v3 = vld [vmem:[%s3823_s4 + $0x15c] sm:$0xf0] }
  0xce   : > { %1150 = vmatmul.bf16.vlgmr.msra.gmra.mxu3 %v3914_v53  ;;  %v2710_v53 = vor.u32 %v3085_v57, %v2709_v6  ;;  %1832 = vmatpush.bf16.msrb.mxu2 %v2842_v47  ;;  %v2750_v58 = vor.u32 %v3093_v54, %v2747_v55  ;;  %v3112_v6 = vld [vmem:[%s3823_s4 + $0x200] sm:$0xf0]  ;;  %v2937_v57 = vld [vmem:[%s3823_s4 + $0x2e8] sm:$0xf]  ;;  %v3130_v47 = vld [vmem:[%s3823_s4 + $0x290] sm:$0xf0] }
  0xcf   : > { %v2938_v9 = vor.u32 %v3142_v7, %v2937_v57  ;;  %v2890_v49 = vor.u32 %v3130_v47, %v2889_v43  ;;  %v2757_v55 = vld [vmem:[%s3823_s4 + $0x180] sm:$0xf]  ;;  %v3071_v57 = vld [vmem:[%s3823_s4 + $0xb8] sm:$0xf0]  ;;  %v3062_v43 = vld [vmem:[%s3823_s4 + $0x70] sm:$0xf0] }
  0xd0   : > { %1807 = vmatpush.bf16.msrb.mxu0 %v2638_v59  ;;  %v2829_v59 = vld [vmem:[%s3823_s4 + $0x210] sm:$0xf] }
  0xd1   : > { %1820 = vmatpush.bf16.msrb.mxu1 %v2734_v63  ;;  %v2830_v62 = vor.u32 %v3115_v61, %v2829_v59  ;;  %v3090_v63 = vld [vmem:[%s3823_s4 + $0x154] sm:$0xf]  ;;  %1845 = vmatpush.bf16.msrb.mxu3 %v2938_v9  ;;  %v2758_v59 = vor.u32 %v3097_v56, %v2757_v55  ;;  %v3127_v61 = vld [vmem:[%s3823_s4 + $0x278] sm:$0xf0]  ;;  %v2783_v56 = vld [vmem:[%s3823_s4 + $0x1bc] sm:$0xf0] }
  0xd2   : > { %v2738_v4 = vor.u32 %v3090_v63, %v2735_v3  ;;  %v2843_v63 = vld [vmem:[%s3823_s4 + $0x234] sm:$0xf0]  ;;  %v3072_v3 = vld [vmem:[%s3823_s4 + $0xc4] sm:$0xf]  ;;  %v3102_v55 = vld [vmem:[%s3823_s4 + $0x1b4] sm:$0xf] }
  0xd3   : > { %1833 = vmatpush.bf16.msrb.mxu2 %v2830_v62  ;;  %v3117_v62 = vld [vmem:[%s3823_s4 + $0x22c] sm:$0xf] }
  0xd4   : > { %1808 = vmatpush.bf16.msrb.mxu0 %v2626_v2  ;;  %v2567_v2 = vld [vmem:[%s3823_s4 + $0xc] sm:$0xf0] }
  0xd5   : > { %1821 = vmatpush.bf16.msrb.mxu1 %v2722_v5  ;;  %v2817_v5 = vld [vmem:[%s3823_s4 + $0x1f8] sm:$0xf] }
  0xd8   : > { %1809 = vmatpush.bf16.msrb.mxu0 %v2614_v60  ;;  %v2818_v60 = vor.u32 %v3112_v6, %v2817_v5  ;;  %v2657_v6 = vld [vmem:[%s3823_s4 + $0xb0] sm:$0xf] }
  0xd9   : > { %1822 = vmatpush.bf16.msrb.mxu1 %v2710_v53  ;;  %v2723_v53 = vld [vmem:[%s3823_s4 + $0x144] sm:$0xf0] }
  0xda   : > { %v2726_v10 = vor.u32 %v3087_v8, %v2723_v53  ;;  %1834 = vmatpush.bf16.msrb.mxu2 %v2818_v60  ;;  %v2865_v8 = vld [vmem:[%s3823_s4 + $0x258] sm:$0xf]  ;;  %v3124_v53 = vld [vmem:[%s3823_s4 + $0x260] sm:$0xf0] }
  0xdb   : > { %v2866_v12 = vor.u32 %v3124_v53, %v2865_v8 }
  0xdc   : > { %1810 = vmatpush.bf16.msrb.mxu0 %v2602_v11  ;;  %v2570_v11 = vor.u32 %v3048_v1, %v2567_v2  ;;  %v2846_v2 = vor.u32 %v3117_v62, %v2843_v63 }
  0xdd   : > { %1823 = vmatpush.bf16.msrb.mxu1 %v2698_v14  ;;  %v2925_v14 = vld [vmem:[%s3823_s4 + $0x2d0] sm:$0xf] }
  0xde   : > { %v2926_v19 = vor.u32 %v3139_v16, %v2925_v14  ;;  %1835 = vmatpush.bf16.msrb.mxu2 %v2806_v15  ;;  %v2831_v14 = vld [vmem:[%s3823_s4 + $0x21c] sm:$0xf0]  ;;  %v2658_v15 = vor.u32 %v3071_v57, %v2657_v6 }
  0xdf   : > { %v2834_v16 = vor.u32 %v3114_v13, %v2831_v14  ;;  %v3095_v13 = vld [vmem:[%s3823_s4 + $0x178] sm:$0xf0] }
  0xe0   : > { %1811 = vmatpush.bf16.msrb.mxu0 %v2590_v17  ;;  %v3084_v17 = vld [vmem:[%s3823_s4 + $0x124] sm:$0xf]  ;;  %1846 = vmatpush.bf16.msrb.mxu3 %v2926_v19 }
  0xe1   : > { %1824 = vmatpush.bf16.msrb.mxu1 %v2686_v20  ;;  %v2714_v20 = vor.u32 %v3084_v17, %v2711_v18  ;;  %v2645_v18 = vld [vmem:[%s3823_s4 + $0x98] sm:$0xf]  ;;  %v3068_v19 = vld [vmem:[%s3823_s4 + $0xa0] sm:$0xf0] }
  0xe4   : > { %1812 = vmatpush.bf16.msrb.mxu0 %v2578_v21  ;;  %v2793_v21 = vld [vmem:[%s3823_s4 + $0x1c8] sm:$0xf] }
  0xe5   : > { %1825 = vmatpush.bf16.msrb.mxu1 %v2674_v41  ;;  %v2794_v24 = vor.u32 %v3106_v22, %v2793_v21  ;;  %v2769_v41 = vld [vmem:[%s3823_s4 + $0x198] sm:$0xf]  ;;  %v3121_v21 = vld [vmem:[%s3823_s4 + $0x248] sm:$0xf0]  ;;  %v3111_v22 = vld [vmem:[%s3823_s4 + $0x1fc] sm:$0xf] }
  0xe7   : > { %1836 = vmatpush.bf16.msrb.mxu2 %v2794_v24  ;;  %v2819_v24 = vld [vmem:[%s3823_s4 + $0x204] sm:$0xf0] }
  0xe8   : > { %1813 = vmatpush.bf16.msrb.mxu0 %v2566_v26  ;;  %v3081_v26 = vld [vmem:[%s3823_s4 + $0x10c] sm:$0xf] }
  0xe9   : > { %1826 = vmatpush.bf16.msrb.mxu1 %v2662_v51  ;;  %v2702_v29 = vor.u32 %v3081_v26, %v2699_v28  ;;  %v2675_v51 = vld [vmem:[%s3823_s4 + $0xe4] sm:$0xf0]  ;;  %v2939_v26 = vld [vmem:[%s3823_s4 + $0x2f4] sm:$0xf0] }
  0xec   : > { %1858 = vmatpush.bf16.msra.mxu0 %v2654_v27  ;;  %v2914_v27 = vor.u32 %v3136_v25, %v2913_v23  ;;  %v3141_v25 = vld [vmem:[%s3823_s4 + $0x2ec] sm:$0xf] }
  0xed   : > { %1871 = vmatpush.bf16.msra.mxu1 %v2750_v58  ;;  %v2877_v58 = vld [vmem:[%s3823_s4 + $0x270] sm:$0xf] }
  0xee   : > { %1847 = vmatpush.bf16.msrb.mxu3 %v2914_v27  ;;  %v2878_v1 = vor.u32 %v3127_v61, %v2877_v58  ;;  %v2646_v27 = vor.u32 %v3068_v19, %v2645_v18  ;;  %v3132_v58 = vld [vmem:[%s3823_s4 + $0x2a4] sm:$0xf]  ;;  %v2903_v61 = vld [vmem:[%s3823_s4 + $0x2ac] sm:$0xf0]  ;;  %v3126_v18 = vld [vmem:[%s3823_s4 + $0x274] sm:$0xf] }
  0xef   : > { %v2906_v63 = vor.u32 %v3132_v58, %v2903_v61  ;;  %v3080_v58 = vld [vmem:[%s3823_s4 + $0x100] sm:$0xf0]  ;;  %v2681_v61 = vld [vmem:[%s3823_s4 + $0xe0] sm:$0xf] }
  0xf0   : > { %1859 = vmatpush.bf16.msra.mxu0 %v2642_v30  ;;  %v2781_v30 = vld [vmem:[%s3823_s4 + $0x1b0] sm:$0xf] }
  0xf1   : > { %1872 = vmatpush.bf16.msra.mxu1 %v2738_v4  ;;  %v2782_v34 = vor.u32 %v3103_v31, %v2781_v30  ;;  %v2663_v4 = vld [vmem:[%s3823_s4 + $0xcc] sm:$0xf0]  ;;  %v2942_v30 = vor.u32 %v3141_v25, %v2939_v26  ;;  %v2633_v31 = vld [vmem:[%s3823_s4 + $0x80] sm:$0xf] }
  0xf2   : > { %v2666_v60 = vor.u32 %v3072_v3, %v2663_v4  ;;  %v3099_v3 = vld [vmem:[%s3823_s4 + $0x19c] sm:$0xf]  ;;  %v2771_v4 = vld [vmem:[%s3823_s4 + $0x1a4] sm:$0xf0] }
  0xf3   : > { %1837 = vmatpush.bf16.msrb.mxu2 %v2782_v34 }
  0xf4   : > { %1860 = vmatpush.bf16.msra.mxu0 %v2630_v33  ;;  %v4128_v33 = vld [vmem:[%s332_s12] sm:$0xf] }
  0xf5   : > { %1873 = vmatpush.bf16.msra.mxu1 %v2726_v10  ;;  %v500_v37 = vperm.slane %v4128_v33, 0 }
  0xf8   : > { %1861 = vmatpush.bf16.msra.mxu0 %v2618_v36  ;;  %v2902_v36 = vor.u32 %v3133_v35, %v2901_v32  ;;  %v3065_v32 = vld [vmem:[%s3823_s4 + $0x88] sm:$0xf0]  ;;  %v3108_v35 = vld [vmem:[%s3823_s4 + $0x1e4] sm:$0xf] }
  0xf9   : > { %1874 = vmatpush.bf16.msra.mxu1 %v2714_v20  ;;  %v2853_v20 = vld [vmem:[%s3823_s4 + $0x240] sm:$0xf] }
  0xfa   : > { %1848 = vmatpush.bf16.msrb.mxu3 %v2902_v36  ;;  %v2854_v23 = vor.u32 %v3121_v21, %v2853_v20  ;;  %v2807_v36 = vld [vmem:[%s3823_s4 + $0x1ec] sm:$0xf0]  ;;  %v2879_v21 = vld [vmem:[%s3823_s4 + $0x27c] sm:$0xf0] }
  0xfb   : > { %v2810_v38 = vor.u32 %v3108_v35, %v2807_v36  ;;  %v2882_v25 = vor.u32 %v3126_v18, %v2879_v21 }
  0xfc   : > { %1862 = vmatpush.bf16.msra.mxu0 %v2606_v42  ;;  %v3100_v42 = vld [vmem:[%s3823_s4 + $0x1a0] sm:$0xf0] }
  0xfd   : > { %1875 = vmatpush.bf16.msra.mxu1 %v2702_v29  ;;  %v2770_v46 = vor.u32 %v3100_v42, %v2769_v41  ;;  %v2822_v29 = vor.u32 %v3111_v22, %v2819_v24  ;;  %v2621_v42 = vld [vmem:[%s3823_s4 + $0x68] sm:$0xf]  ;;  %v3050_v24 = vld [vmem:[%s3823_s4 + $0x10] sm:$0xf0] }
  0xfe   : > { %1849 = vmatpush.bf16.msrb.mxu3 %v2890_v49  ;;  %v2622_v49 = vor.u32 %v3062_v43, %v2621_v42  ;;  %v3120_v42 = vld [vmem:[%s3823_s4 + $0x244] sm:$0xf]  ;;  %v2855_v43 = vld [vmem:[%s3823_s4 + $0x24c] sm:$0xf0] }
  0xff   : > { %1838 = vmatpush.bf16.msrb.mxu2 %v2770_v46  ;;  %v3135_v46 = vld [vmem:[%s3823_s4 + $0x2bc] sm:$0xf] }
 0x100   : > { %1863 = vmatpush.bf16.msra.mxu0 %v2594_v50  ;;  %v3075_v50 = vld [vmem:[%s3823_s4 + $0xdc] sm:$0xf] }
 0x101   : > { %1876 = vmatpush.bf16.msra.mxu1 %v2690_v40  ;;  %v2678_v52 = vor.u32 %v3075_v50, %v2675_v51  ;;  %v2634_v40 = vor.u32 %v3065_v32, %v2633_v31  ;;  %v501_v51 = vperm.slane %v4128_v33, 1  ;;  %v3123_v31 = vld [vmem:[%s3823_s4 + $0x25c] sm:$0xf]  ;;  %v2867_v32 = vld [vmem:[%s3823_s4 + $0x264] sm:$0xf0] }
 0x102   : > { %1850 = vmatpush.bf16.msrb.mxu3 %v2878_v1  ;;  %v2597_v1 = vld [vmem:[%s3823_s4 + $0x38] sm:$0xf] }
 0x103   : > { %1839 = vmatpush.bf16.msrb.mxu2 %v2758_v59  ;;  %v2786_v59 = vor.u32 %v3102_v55, %v2783_v56  ;;  %v2693_v56 = vld [vmem:[%s3823_s4 + $0xf8] sm:$0xf] }
 0x104   : > { %1864 = vmatpush.bf16.msra.mxu0 %v2582_v0 }
 0x105   : > { %1877 = vmatpush.bf16.msra.mxu1 %v2678_v52  ;;  %v2609_v52 = vld [vmem:[%s3823_s4 + $0x50] sm:$0xf] }
 0x106   : > { %1851 = vmatpush.bf16.msrb.mxu3 %v2866_v12  ;;  %v2753_v12 = vld [vmem:[%s3823_s4 + $0x170] sm:$0xf] }
 0x107   : > { %1884 = vmatpush.bf16.msra.mxu2 %v2846_v2  ;;  %v3056_v2 = vld [vmem:[%s3823_s4 + $0x40] sm:$0xf0]  ;;  %v2754_v26 = vor.u32 %v3095_v13, %v2753_v12 }
 0x108   : > { %1865 = vmatpush.bf16.msra.mxu0 %v2570_v11  ;;  %v1008_v44 = vpop.f32.mrf.mxu0  ;;  %v2598_v57 = vor.u32 %v3056_v2, %v2597_v1  ;;  %v503_v1 = vperm.slane %v4128_v33, 3 }
 0x109   : > { %v1021_v45 = vpop.f32.mrf.mxu1  ;;  %v1009_v48 = vadd.f32 %v1008_v44, %v500_v37  ;;  %1878 = vmatpush.bf16.msra.mxu1 %v2666_v60  ;;  %v3138_v37 = vld [vmem:[%s3823_s4 + $0x2d4] sm:$0xf]  ;;  %v3105_v44 = vld [vmem:[%s3823_s4 + $0x1cc] sm:$0xf]  ;;  %v2774_v60 = vor.u32 %v3099_v3, %v2771_v4 }
 0x10a   : > { %1852 = vmatpush.bf16.msrb.mxu3 %v2854_v23  ;;  %v2930_v41 = vor.u32 %v3138_v37, %v2927_v39  ;;  %v2573_v23 = vld [vmem:[%s3823_s4 + $0x8] sm:$0xf]  ;;  %v2870_v37 = vor.u32 %v3123_v31, %v2867_v32  ;;  %v2933_v31 = vld [vmem:[%s3823_s4 + $0x2d8] sm:$0xf]  ;;  %v3140_v32 = vld [vmem:[%s3823_s4 + $0x2e0] sm:$0xf0] }
 0x10b   : > { %v1022_v54 = vadd.f32 %v1021_v45, %v1009_v48  ;;  %1885 = vmatpush.bf16.msra.mxu2 %v2834_v16  ;;  %v2795_v45 = vld [vmem:[%s3823_s4 + $0x1d4] sm:$0xf0]  ;;  %v2915_v48 = vld [vmem:[%s3823_s4 + $0x2c4] sm:$0xf0]  ;;  %v2759_v16 = vld [vmem:[%s3823_s4 + $0x18c] sm:$0xf0]  ;;  %v2574_v35 = vor.u32 %v3050_v24, %v2573_v23 }
 0x10c   : > { %v2798_v47 = vor.u32 %v3105_v44, %v2795_v45  ;;  %v2918_v50 = vor.u32 %v3135_v46, %v2915_v48  ;;  %v2858_v44 = vor.u32 %v3120_v42, %v2855_v43  ;;  %v3086_v48 = vld [vmem:[%s3823_s4 + $0x130] sm:$0xf0]  ;;  %v3143_v23 = vld [vmem:[%s3823_s4 + $0x2f8] sm:$0xf0]  ;;  %v2789_v43 = vld [vmem:[%s3823_s4 + $0x1b8] sm:$0xf] }
 0x10e   : > { %1897 = vmatpush.bf16.msra.mxu3 %v2942_v30  ;;  %v3092_v30 = vld [vmem:[%s3823_s4 + $0x160] sm:$0xf0] }
 0x10f   : > { %1886 = vmatpush.bf16.msra.mxu2 %v2822_v29 }
 0x110   : > { %v1010_v10 = vpop.f32.mrf.mxu0 }
 0x111   : > { %v4150_v7 = vpop.f32.mrf.mxu3  ;;  %v1023_v11 = vpop.f32.mrf.mxu1  ;;  %v3053_v10 = vld [vmem:[%s3823_s4 + $0x28] sm:$0xf0] }
 0x112   : > { %v1034_v0 = vpop.f32.mrf.mxu2  ;;  %1898 = vmatpush.bf16.msra.mxu3 %v2930_v41  ;;  %v3089_v41 = vld [vmem:[%s3823_s4 + $0x148] sm:$0xf0] }
 0x113   : > { %v1035_v5 = vadd.f32 %v1034_v0, %v1022_v54  ;;  %1887 = vmatpush.bf16.msra.mxu2 %v2810_v38  ;;  %v3059_v54 = vld [vmem:[%s3823_s4 + $0x58] sm:$0xf0]  ;;  %v1048_v0 = vadd.f32 %v4150_v7, %v501_v51  ;;  %v2891_v7 = vld [vmem:[%s3823_s4 + $0x294] sm:$0xf0]  ;;  %v2705_v51 = vld [vmem:[%s3823_s4 + $0x110] sm:$0xf] }
 0x114   : > { %v2610_v62 = vor.u32 %v3059_v54, %v2609_v52  ;;  %v3083_v52 = vld [vmem:[%s3823_s4 + $0x118] sm:$0xf0]  ;;  %v502_v54 = vperm.slane %v4128_v33, 2  ;;  %v2837_v33 = vld [vmem:[%s3823_s4 + $0x218] sm:$0xf] }
 0x115   : > { %v1155_v9 = vmax.f32 %v1035_v5, 0.0  ;;  %v3129_v5 = vld [vmem:[%s3823_s4 + $0x28c] sm:$0xf]  ;;  %v2706_v55 = vor.u32 %v3083_v52, %v2705_v51  ;;  %v2897_v51 = vld [vmem:[%s3823_s4 + $0x290] sm:$0xf] }
 0x116   : > { %1899 = vmatpush.bf16.msra.mxu3 %v2918_v50  ;;  %v2894_v11 = vor.u32 %v3129_v5, %v2891_v7  ;;  %v2849_v5 = vld [vmem:[%s3823_s4 + $0x230] sm:$0xf]  ;;  %v3131_v52 = vld [vmem:[%s3823_s4 + $0x298] sm:$0xf0] }
 0x117   : > { %v4156_v17 = vpack.c.bf16 %v1155_v9, %v1155_v9  ;;  %1888 = vmatpush.bf16.msra.mxu2 %v2798_v47  ;;  %v2585_v9 = vld [vmem:[%s3823_s4 + $0x20] sm:$0xf]  ;;  %v2717_v47 = vld [vmem:[%s3823_s4 + $0x128] sm:$0xf] }
 0x118   : > { %v2586_v19 = vor.u32 %v3053_v10, %v2585_v9  ;;  %v2718_v50 = vor.u32 %v3086_v48, %v2717_v47 }
 0x119   : > { %1814 = vmatmul.bf16.vlgmr.msrb.gmra.mxu0 %v4156_v17  ;;  %v1049_v34 = vpop.f32.mrf.mxu3 }
 0x11a   : > { %1910 = vmatpush.bf16.msrb.mxu0 %v2658_v15  ;;  %v1036_v28 = vpop.f32.mrf.mxu2  ;;  %1900 = vmatpush.bf16.msra.mxu3 %v2906_v63  ;;  %v3096_v15 = vld [vmem:[%s3823_s4 + $0x184] sm:$0xf] }
 0x11b   : > { %1889 = vmatpush.bf16.msra.mxu2 %v2786_v59  ;;  %v2762_v20 = vor.u32 %v3096_v15, %v2759_v16  ;;  %v2694_v59 = vor.u32 %v3080_v58, %v2693_v56  ;;  %v2765_v56 = vld [vmem:[%s3823_s4 + $0x188] sm:$0xf]  ;;  %v3098_v58 = vld [vmem:[%s3823_s4 + $0x190] sm:$0xf0] }
 0x11e   : > { %1911 = vmatpush.bf16.msrb.mxu0 %v2646_v27  ;;  %1901 = vmatpush.bf16.msra.mxu3 %v2894_v11  ;;  %v2741_v27 = vld [vmem:[%s3823_s4 + $0x158] sm:$0xf]  ;;  %v3116_v11 = vld [vmem:[%s3823_s4 + $0x220] sm:$0xf0] }
 0x11f   : > { %1890 = vmatpush.bf16.msra.mxu2 %v2774_v60  ;;  %v2742_v39 = vor.u32 %v3092_v30, %v2741_v27  ;;  %v3074_v60 = vld [vmem:[%s3823_s4 + $0xd0] sm:$0xf0]  ;;  %v2838_v16 = vor.u32 %v3116_v11, %v2837_v33  ;;  %v2813_v27 = vld [vmem:[%s3823_s4 + $0x1e8] sm:$0xf] }
 0x122   : > { %1912 = vmatpush.bf16.msrb.mxu0 %v2634_v40  ;;  %1902 = vmatpush.bf16.msra.mxu3 %v2882_v25  ;;  %v2729_v40 = vld [vmem:[%s3823_s4 + $0x140] sm:$0xf] }
 0x123   : > { %1891 = vmatpush.bf16.msra.mxu2 %v2762_v20  ;;  %v2730_v45 = vor.u32 %v3089_v41, %v2729_v40  ;;  %v3113_v20 = vld [vmem:[%s3823_s4 + $0x208] sm:$0xf0] }
 0x124   : > { %v3137_v40 = vld [vmem:[%s3823_s4 + $0x2c8] sm:$0xf0] }
 0x126   : > { %1913 = vmatpush.bf16.msrb.mxu0 %v2622_v49  ;;  %1903 = vmatpush.bf16.msra.mxu3 %v2870_v37  ;;  %v2801_v37 = vld [vmem:[%s3823_s4 + $0x1d0] sm:$0xf] }
 0x128   : > { %v1060_v6 = vpop.f32.mrf.mxu0 }
 0x129   : > { %1866 = vmatmul.bf16.vlgmr.msra.gmra.mxu0 %v4156_v17  ;;  %v1061_v8 = vadd.f32 %v1060_v6, %v1048_v0  ;;  %v1073_v53 = vpop.f32.mrf.mxu1  ;;  %v3119_v6 = vld [vmem:[%s3823_s4 + $0x238] sm:$0xf0] }
 0x12a   : > { %1914 = vmatpush.bf16.msrb.mxu0 %v2610_v62  ;;  %1904 = vmatpush.bf16.msra.mxu3 %v2858_v44  ;;  %v3077_v62 = vld [vmem:[%s3823_s4 + $0xe8] sm:$0xf0]  ;;  %v3104_v44 = vld [vmem:[%s3823_s4 + $0x1c0] sm:$0xf0] }
 0x12b   : > { %v1074_v14 = vadd.f32 %v1073_v53, %v1061_v8  ;;  %v2682_v4 = vor.u32 %v3077_v62, %v2681_v61  ;;  %v2850_v53 = vor.u32 %v3119_v6, %v2849_v5  ;;  %v2790_v47 = vor.u32 %v3104_v44, %v2789_v43 }
 0x12c   : > { %v2766_v61 = vor.u32 %v3098_v58, %v2765_v56 }
 0x12d   : > { %v1156_v22 = vmax.f32 %v1074_v14, 0.0 }
 0x12e   : > { %1915 = vmatpush.bf16.msrb.mxu0 %v2598_v57  ;;  %v2669_v57 = vld [vmem:[%s3823_s4 + $0xc8] sm:$0xf] }
 0x12f   : > { %v4205_v28 = vpack.c.bf16 %v1156_v22, %v1156_v22  ;;  %v2670_v10 = vor.u32 %v3074_v60, %v2669_v57  ;;  %v2945_v22 = vld [vmem:[%s3823_s4 + $0x2f0] sm:$0xf] }
 0x130   : > { %v1062_v36 = vpop.f32.mrf.mxu0 }
 0x131   : > { %v1099_v34 = vpop.f32.mrf.mxu3  ;;  %1827 = vmatmul.bf16.vlgmr.msrb.gmra.mxu1 %v4205_v28  ;;  %v1075_v38 = vpop.f32.mrf.mxu1  ;;  %v2934_v36 = vor.u32 %v3140_v32, %v2933_v31 }
 0x132   : > { %v1086_v29 = vpop.f32.mrf.mxu2  ;;  %1916 = vmatpush.bf16.msrb.mxu0 %v2586_v19  ;;  %1923 = vmatpush.bf16.msrb.mxu1 %v2754_v26  ;;  %v2825_v19 = vld [vmem:[%s3823_s4 + $0x200] sm:$0xf]  ;;  %v2946_v26 = vor.u32 %v3143_v23, %v2945_v22  ;;  %v3107_v38 = vld [vmem:[%s3823_s4 + $0x1d8] sm:$0xf0] }
 0x133   : > { %v2826_v25 = vor.u32 %v3113_v20, %v2825_v19  ;;  %v2802_v41 = vor.u32 %v3107_v38, %v2801_v37  ;;  %v1161_v37 = vld [vmem:[#allocation2 + $0x8] sm:$0xff] }
 0x136   : > { %1917 = vmatpush.bf16.msrb.mxu0 %v2574_v35  ;;  %1924 = vmatpush.bf16.msrb.mxu1 %v2742_v39  ;;  %v2921_v39 = vld [vmem:[%s3823_s4 + $0x2c0] sm:$0xf] }
 0x137   : > { %v2922_v42 = vor.u32 %v3137_v40, %v2921_v39 }
 0x139   : > { %1918 = vmatmul.bf16.vlgmr.msrb.gmra.mxu0 %v4156_v17  ;;  %v1101_v49 = vpop.f32.mrf.mxu3  ;;  %v1087_v17 = vadd.f32 %v1086_v29, %v502_v54  ;;  %v3110_v29 = vld [vmem:[%s3823_s4 + $0x1f0] sm:$0xf0] }
 0x13a   : > { %v1088_v46 = vpop.f32.mrf.mxu2  ;;  %1925 = vmatpush.bf16.msrb.mxu1 %v2730_v45  ;;  %v2909_v45 = vld [vmem:[%s3823_s4 + $0x2a8] sm:$0xf]  ;;  %v2777_v49 = vld [vmem:[%s3823_s4 + $0x1a0] sm:$0xf] }
 0x13b   : > { %v1100_v63 = vadd.f32 %v1099_v34, %v1087_v17  ;;  %v3134_v46 = vld [vmem:[%s3823_s4 + $0x2b0] sm:$0xf0]  ;;  %v2885_v17 = vld [vmem:[%s3823_s4 + $0x278] sm:$0xf] }
 0x13c   : > { %v2910_v48 = vor.u32 %v3134_v46, %v2909_v45 }
 0x13e   : > { %1926 = vmatpush.bf16.msrb.mxu1 %v2718_v50  ;;  %v3101_v50 = vld [vmem:[%s3823_s4 + $0x1a8] sm:$0xf0] }
 0x13f   : > { %v2778_v54 = vor.u32 %v3101_v50, %v2777_v49 }
 0x141   : > { %1879 = vmatmul.bf16.vlgmr.msra.gmra.mxu1 %v4205_v28 }
 0x142   : > { %1927 = vmatpush.bf16.msrb.mxu1 %v2706_v55  ;;  %v2898_v55 = vor.u32 %v3131_v52, %v2897_v51 }
 0x146   : > { %1928 = vmatpush.bf16.msrb.mxu1 %v2694_v59  ;;  %v3128_v59 = vld [vmem:[%s3823_s4 + $0x280] sm:$0xf0] }
 0x147   : > { %v2886_v62 = vor.u32 %v3128_v59, %v2885_v17 }
 0x148   : > { %v1112_v0 = vpop.f32.mrf.mxu0 }
 0x149   : > { %v1113_v2 = vadd.f32 %v1112_v0, %v1100_v63  ;;  %v1125_v3 = vpop.f32.mrf.mxu1  ;;  %v2873_v63 = vld [vmem:[%s3823_s4 + $0x260] sm:$0xf]  ;;  %v3125_v0 = vld [vmem:[%s3823_s4 + $0x268] sm:$0xf0] }
 0x14a   : > { %v1126_v8 = vadd.f32 %v1125_v3, %v503_v1  ;;  %1929 = vmatpush.bf16.msrb.mxu1 %v2682_v4  ;;  %v2874_v1 = vor.u32 %v3125_v0, %v2873_v63  ;;  %v3122_v3 = vld [vmem:[%s3823_s4 + $0x250] sm:$0xf0] }
 0x14b   : > { %v1157_v7 = vmax.f32 %v1113_v2, 0.0  ;;  %v2861_v2 = vld [vmem:[%s3823_s4 + $0x248] sm:$0xf] }
 0x14c   : > { %v2862_v4 = vor.u32 %v3122_v3, %v2861_v2 }
 0x14d   : > { %v4231_v9 = vpack.c.bf16 %v1157_v7, %v1157_v7 }
 0x14e   : > { %1930 = vmatpush.bf16.msrb.mxu1 %v2670_v10 }
 0x14f   : > { %1840 = vmatmul.bf16.vlgmr.msrb.gmra.mxu2 %v4231_v9 }
 0x150   : > { %v1138_v12 = vpop.f32.mrf.mxu2  ;;  %v1114_v15 = vpop.f32.mrf.mxu0  ;;  %1936 = vmatpush.bf16.msrb.mxu2 %v2850_v53 }
 0x151   : > { %v1139_v13 = vadd.f32 %v1138_v12, %v1126_v8  ;;  %v1151_v14 = vpop.f32.mrf.mxu3  ;;  %v1127_v18 = vpop.f32.mrf.mxu1  ;;  %1931 = vmatmul.bf16.vlgmr.msrb.gmra.mxu1 %v4205_v28  ;;  %v2814_v28 = vor.u32 %v3110_v29, %v2813_v27  ;;  %v1160_v27 = vld [vmem:[#allocation2] sm:$0xff] }
 0x152   : > { %v1159_v18 = vld [vmem:[#allocation2 + $0x10] sm:$0xff] }
 0x153   : > { %v1152_v21 = vadd.f32 %v1151_v14, %v1139_v13 }
 0x154   : > { %1937 = vmatpush.bf16.msrb.mxu2 %v2838_v16 }
 0x155   : > { %v1158_v24 = vmax.f32 %v1152_v21, 0.0 }
 0x157   : > { %v1165_v30 = vpack.c.bf16 %v1158_v24, %v1158_v24 }
 0x158   : > { %v1140_v34 = vpop.f32.mrf.mxu2  ;;  %1938 = vmatpush.bf16.msrb.mxu2 %v2826_v25 }
 0x159   : > { %v1153_v35 = vpop.f32.mrf.mxu3  ;;  %1853 = vmatmul.bf16.vlgmr.msrb.gmra.mxu3 %v1165_v30 }
 0x15a   : > { %1949 = vmatpush.bf16.msrb.mxu3 %v2946_v26 }
 0x15c   : > { %1939 = vmatpush.bf16.msrb.mxu2 %v2814_v28 }
 0x15e   : > { %1950 = vmatpush.bf16.msrb.mxu3 %v2934_v36 }
 0x15f   : > { %1892 = vmatmul.bf16.vlgmr.msra.gmra.mxu2 %v4231_v9 }
 0x160   : > { %1940 = vmatpush.bf16.msrb.mxu2 %v2802_v41 }
 0x162   : > { %1951 = vmatpush.bf16.msrb.mxu3 %v2922_v42 }
 0x164   : > { %1941 = vmatpush.bf16.msrb.mxu2 %v2790_v47 }
 0x166   : > { %1952 = vmatpush.bf16.msrb.mxu3 %v2910_v48 }
 0x168   : > { %1942 = vmatpush.bf16.msrb.mxu2 %v2778_v54 }
 0x169   : > { %1905 = vmatmul.bf16.vlgmr.msra.gmra.mxu3 %v1165_v30 }
 0x16a   : > { %1953 = vmatpush.bf16.msrb.mxu3 %v2898_v55 }
 0x16c   : > { %1943 = vmatpush.bf16.msrb.mxu2 %v2766_v61 }
 0x16e   : > { %1954 = vmatpush.bf16.msrb.mxu3 %v2886_v62 }
 0x16f   : > { %1944 = vmatmul.bf16.vlgmr.msrb.gmra.mxu2 %v4231_v9 }
 0x172   : > { %1955 = vmatpush.bf16.msrb.mxu3 %v2874_v1 }
 0x176   : > { %1956 = vmatpush.bf16.msrb.mxu3 %v2862_v4 }
 0x179   : > { %1957 = vmatmul.bf16.vlgmr.msrb.gmra.mxu3 %v1165_v30 }
 0x196   : > { %v1815_v5 = vpop.f32.mrf.mxu0 }
 0x19e   : > { %v1817_v6 = vpop.f32.mrf.mxu0 }
 0x1a6   : > { %v1867_v57 = vpop.f32.mrf.mxu0 }
 0x1ae   : > { %v1869_v60 = vpop.f32.mrf.mxu0  ;;  %v1828_v7 = vpop.f32.mrf.mxu1 }
 0x1af   : > { %v1829_v14 = vadd.f32 %v1828_v7, %v1815_v5 }
 0x1b6   : > { %v1919_v8 = vpop.f32.mrf.mxu0  ;;  %v1830_v53 = vpop.f32.mrf.mxu1 }
 0x1be   : > { %v1921_v10 = vpop.f32.mrf.mxu0  ;;  %v1880_v33 = vpop.f32.mrf.mxu1 }
 0x1bf   : > { %v1881_v24 = vadd.f32 %v1880_v33, %v1867_v57 }
 0x1c6   : > { %v1882_v11 = vpop.f32.mrf.mxu1 }
 0x1ce   : > { %v1932_v12 = vpop.f32.mrf.mxu1 }
 0x1cf   : > { %v1933_v35 = vadd.f32 %v1932_v12, %v1919_v8 }
 0x1d2   : > { %v1841_v13 = vpop.f32.mrf.mxu2 }
 0x1d3   : > { %v1842_v16 = vadd.f32 %v1841_v13, %v1829_v14 }
 0x1d6   : > { %v1934_v15 = vpop.f32.mrf.mxu1 }
 0x1da   : > { %v1843_v9 = vpop.f32.mrf.mxu2 }
 0x1dc   : > { %v1854_v19 = vpop.f32.mrf.mxu3 }
 0x1dd   : > { %v1855_v20 = vadd.f32 %v1854_v19, %v1842_v16 }
 0x1df   : > { %v1962_v21 = vadd.f32 %v1855_v20, %v1159_v18 }
 0x1e1   : > { %1965 = vst [vmem:[#allocation2 + $0x10] sm:$0xff] %v1962_v21 }
 0x1e2   : > { %v1893_v22 = vpop.f32.mrf.mxu2 }
 0x1e3   : > { %v1894_v25 = vadd.f32 %v1893_v22, %v1881_v24 }
 0x1e4   : > { %v1856_v23 = vpop.f32.mrf.mxu3 }
 0x1ea   : > { %v1895_v26 = vpop.f32.mrf.mxu2 }
 0x1ec   : > { %v1906_v29 = vpop.f32.mrf.mxu3 }
 0x1ed   : > { %v1907_v30 = vadd.f32 %v1906_v29, %v1894_v25 }
 0x1ef   : > { %v1963_v31 = vadd.f32 %v1907_v30, %v1160_v27 }
 0x1f1   : > { %1966 = vst [vmem:[#allocation2] sm:$0xff] %v1963_v31 }
 0x1f2   : > { %v1945_v32 = vpop.f32.mrf.mxu2 }
 0x1f3   : > { %v1946_v28 = vadd.f32 %v1945_v32, %v1933_v35 }
 0x1f4   : > { %v1908_v34 = vpop.f32.mrf.mxu3 }
 0x1fa   : > { %v1947_v36 = vpop.f32.mrf.mxu2 }
 0x1fc   : > { %v1958_v38 = vpop.f32.mrf.mxu3 }
 0x1fd   : > { %v1959_v39 = vadd.f32 %v1958_v38, %v1946_v28 }
 0x1ff   : > { %v1964_v40 = vadd.f32 %v1959_v39, %v1161_v37 }
 0x200   : > { %1971 = sbr.rel (%p2947_p7) target bundleno = 525 (0x20d), region = 68 }
 0x201   : > { %1967 = vst [vmem:[#allocation2 + $0x8] sm:$0xff] %v1964_v40 }
 0x204   : > { %v1960_v41 = vpop.f32.mrf.mxu3 }
 0x205   : > { %v1972_v42 = vld [vmem:[#allocation2 + $0x10] sm:$0xff]  ;;  %v1975_v43 = vld [vmem:[#allocation11] sm:$0x7]  ;;  %v1973_v44 = vld [vmem:[#allocation2] sm:$0xff] }
 0x206   : > { %v1977_v45 = vperm.slane %v1975_v43, 0  ;;  %v1978_v46 = vperm.slane %v1975_v43, 1  ;;  %v1979_v48 = vperm.slane %v1975_v43, 2 }
 0x208   : > { %v1974_v47 = vld [vmem:[#allocation2 + $0x8] sm:$0xff]  ;;  %v1983_v49 = vadd.f32 %v1977_v45, %v1972_v42  ;;  %v1984_v50 = vadd.f32 %v1978_v46, %v1973_v44 }
 0x209   : > { %v1985_v51 = vadd.f32 %v1979_v48, %v1974_v47 }
 0x20a   : > { %1986 = vst [vmem:[%s3834_s21] sm:$0xff] %v1983_v49 }
 0x20b   : > { %1987 = vst [vmem:[%s3834_s21 + $0x8] sm:$0xff] %v1984_v50 }
 0x20c   : > { %1988 = vst [vmem:[%s3834_s21 + $0x10] sm:$0xff] %v1985_v51 }
 0x20d PF: > { %s4374_s6 = sld [smem:[#allocation21_spill]]  ;;  %s2003_s8 = sshll.u32 %s3834_s21, 4  ;;  %s2004_s8 = int_to_ptr.vmem [resolvable:$true] %s2003_s8 }
 0x20e   : > { %s4376_s16 = sld [smem:[#allocation31_spill]]  ;;  %s1990_s10 = scalar_lea.sflag [#allocation5], %s3802_s15 }
 0x213   : > { %s3152_s27 = smul.u32 24, %s4374_s6 }
 0x214   : > { %s3457_s25 = scalar_lea.hbm %s4376_s16, 48 }
 0x215   : > { %s2001_s18 = scalar_lea.hbm %s4376_s16, %s3152_s27 }
 0x216   : > { %s2005_s11 = sshll.u32 %s2001_s18, 4  ;;  %s2006_s11 = int_to_ptr.hbm [resolvable:$true] %s2005_s11 }
 0x217   : > { %s3451_s13 = sshra.s32 %s2006_s11, 4  ;;  %s3452_s13 = int_to_ptr.hbm [resolvable:$true] %s3451_s13 }
 0x218   : > { %s3453_s24 = scalar_lea.hbm %s3452_s13, 24  ;;  %p3458_p10 = scmp.lt.s32.totalorder %s3452_s13, %s4376_s16 }
 0x219   : > { %p3454_p5 = scmp.ne.s32.totalorder %s3452_s13, %s3453_s24  ;;  %p3459_p12 = scmp.lt.s32.totalorder %s3457_s25, %s3453_s24 }
 0x21b   : > { %p3455_p6 = pnand %p3454_p5, %p3749_p2  ;;  %p3460_p0 = por %p3459_p12, %p3458_p10 }
 0x21d   : > { %p3456_p8 = pneg %p3455_p6 }
 0x21f   : > { %p3461_p4 = pnand %p3460_p0, %p3456_p8 }
 0x221   : > { %3464 = shalt.err (!%p3461_p4)
}
 0x222   : > { %3165 = dma.vmem_to_hbm [thread:$0]  (%p3749_p2), %s2004_s8, 384, %s2006_s11, %s1990_s10  }
 0x223 PF: > { %s4377_s15 = sld [smem:[#allocation18_spill]]  ;;  %p3191_p3 = scmp.ge.s32.totalorder %s3571_s28, 2 }
 0x225   : > { %p3185_p1 = pnand %p3191_p3, %p3766_p11 }
 0x227   : > { %p3186_p9 = pneg %p3185_p1 }
 0x229   : > { %s2017_s5 = sand.u32 1, %s4377_s15  }
 0x22a   : > { %s2018_s21 = scalar_lea.sflag [#allocation5], %s2017_s5 }
 0x22b   : > { %3526 = dma.done.wait (%p3186_p9), %s2018_s21, 384  }
 0x22c   : > { %3528 = vsyncadd (%p3186_p9), %s2018_s21, 4294966912  ;;  %s27_s28 = sadd.s32 1, %s3571_s28   ;;  %s4379_s9 = sld [smem:[#allocation26_spill]] }
 0x22d   : > { %p24_p13 = scmp.ge.s32.totalorder %s27_s28, 8   ;;  %s4380_s29 = sld [smem:[#allocation19_spill]] }
 0x22e   : > { %s4381_s23 = sld [smem:[#allocation28_spill]]  ;;  %s4385_s18 = smov %s3535_s19 }
 0x22f   : > { %s4382_s25 = sld [smem:[#allocation22_spill]]  ;;  %s4386_s19 = smov %s3539_s20 }
 0x230   : > { %s4383_s6 = sld [smem:[#allocation23_spill]]  ;;  %s4388_s21 = smov %s3547_s22 }
 0x231   : > { %s4384_s27 = sld [smem:[#allocation25_spill]]  ;;  %s4390_s24 = smov %s3563_s26 }
 0x232   : > { %s4387_s20 = smov %s4379_s9  ;;  %26 = sbr.rel (!%p24_p13) target bundleno = 17 (0x11), region = 134 }
 0x233   : > { %s4389_s22 = smov %s4380_s29 }
 0x236   : > { %s4391_s26 = smov %s4383_s6 }
 0x237   :  { %2024 = vsyncpa [#allocation4], 1 }
 0x238   :  { %2026 = vsyncpa [#allocation4 + $0x1], 1 }
 0x239   :  { %2027 = vsyncpa [#allocation7], 1 }
 0x23a   :  { %2029 = vsyncpa [#allocation7 + $0x1], 1 }
 0x23b   :  { %2030 = vsyncpa [#allocation10], 1 }
 0x23c   :  { %2032 = vsyncpa [#allocation10 + $0x1], 1 }
 0x23d   :  { %2033 = vsyncpa [#allocation5], 1 }
 0x23e   :  { %2035 = vsyncpa [#allocation5 + $0x1], 1 }

</bundles_post_ra>
